<compile_context>
chip_gen: v6e
topology: v6e:2x2x1
jax: 0.10.0
libtpu: 0.0.40
codegen_flags: <defaults>
</compile_context>

<pallas_src>
import functools
import math

import jax
import jax.numpy as jnp
from jax import lax
from jax.experimental import pallas as pl
from jax.experimental.pallas import tpu as pltpu

LN_EPS = 1e-5  # PyTorch LayerNorm default


def _round_up(v, m):
    return (v + m - 1) // m * m


def gine_layer_kernel(x_row_ref, x_col_ref, a_ref, gamma_ref, beta_ref,
                      w_ref, b_ref, ope_ref, o_ref, acc_ref, *, c_real):
    k = pl.program_id(1)
    nk = pl.num_programs(1)
    gamma = gamma_ref[...]          # [1, Cp] (zero in padded lanes)
    beta = beta_ref[...]            # [1, Cp] (zero in padded lanes)
    inv_c = 1.0 / c_real

    def ln_act(x):
        # LayerNorm over the first c_real lanes (padded lanes of x are zero),
        # followed by ReLU (self.act).  Output is exactly zero in padded lanes.
        mask = lax.broadcasted_iota(jnp.int32, x.shape, 1) < c_real
        mean = jnp.sum(x, axis=-1, keepdims=True) * inv_c
        cen = jnp.where(mask, x - mean, 0.0)
        var = jnp.sum(cen * cen, axis=-1, keepdims=True) * inv_c
        h = cen * lax.rsqrt(var + LN_EPS) * gamma + beta
        return jnp.maximum(h, 0.0)

    @pl.when(k == 0)
    def _init():
        # Fold (1+eps)*h_i directly into the accumulator init.
        h_row = ln_act(x_row_ref[...])
        acc_ref[...] = ope_ref[...] * h_row

    # GINE messages: relu(h_j + e_ji) with e == 0  ->  msg == h (already >= 0).
    msg = ln_act(x_col_ref[...]).astype(jnp.bfloat16)
    acc_ref[...] += jnp.dot(a_ref[...], msg,
                            preferred_element_type=jnp.float32)

    @pl.when(k == nk - 1)
    def _finalize():
        # GINEConv.nn = Linear(in, out); bf16 operands, f32 accumulate.
        z = acc_ref[...].astype(jnp.bfloat16)
        out = jnp.dot(z, w_ref[...],
                      preferred_element_type=jnp.float32) + b_ref[...]
        # Residual add (module usage requires in_channels == out_channels).
        # TODO(synk): training-mode Dropout (pltpu.prng_* Bernoulli mask);
        # eval semantics (identity) implemented here.
        o_ref[...] = out + x_row_ref[...]


@functools.partial(jax.jit, static_argnames=("num_nodes", "tile_m", "tile_k"))
def gine_layer(x, edge_index, gamma, beta, w, b, eps, *, num_nodes,
               tile_m=128, tile_k=128):
    """x: [N, C] f32, edge_index: [2, E] int32, w: [C, C_out] (== W^T)."""
    n, c = x.shape
    c_out = w.shape[1]
    cp = _round_up(max(c, c_out), 128)                 # lane-dense channels
    np_ = _round_up(num_nodes, math.lcm(tile_m, tile_k))

    # Dense adjacency (dst rows, src cols) in bf16: per-pair edge counts are
    # small integers -> exact in bf16 (assumes multiplicity < 256).
    src = edge_index[0]
    dst = edge_index[1]
    adj = jnp.zeros((np_, np_), jnp.float32).at[dst, src].add(1.0)
    adj = adj.astype(jnp.bfloat16)

    x32 = x.astype(jnp.float32)
    xp = jnp.zeros((np_, cp), jnp.float32).at[:n, :c].set(x32)
    gp = jnp.zeros((1, cp), jnp.float32).at[0, :c].set(gamma.astype(jnp.float32))
    bp = jnp.zeros((1, cp), jnp.float32).at[0, :c].set(beta.astype(jnp.float32))
    wp = (jnp.zeros((cp, cp), jnp.float32)
          .at[:c, :c_out].set(w.astype(jnp.float32))).astype(jnp.bfloat16)
    bbp = jnp.zeros((1, cp), jnp.float32).at[0, :c_out].set(b.astype(jnp.float32))
    ope = (1.0 + jnp.asarray(eps, jnp.float32)) * jnp.ones((1, cp), jnp.float32)

    grid = (np_ // tile_m, np_ // tile_k)
    kernel = functools.partial(gine_layer_kernel, c_real=c)

    cost = pl.CostEstimate(
        flops=2 * np_ * np_ * cp + 2 * np_ * cp * cp + 10 * np_ * cp,
        transcendentals=np_ * (grid[0] + 1),
        bytes_accessed=(np_ * np_ * 2          # adjacency (bf16)
                        + 2 * np_ * cp * 4     # x (read twice) f32
                        + cp * cp * 2          # W bf16
                        + np_ * cp * 4))       # output f32

    out = pl.pallas_call(
        kernel,
        out_shape=jax.ShapeDtypeStruct((np_, cp), jnp.float32),
        grid_spec=pltpu.PrefetchScalarGridSpec(
            num_scalar_prefetch=0,
            grid=grid,
            in_specs=[
                pl.BlockSpec((tile_m, cp), lambda i, k: (i, 0)),      # x rows (resident over k)
                pl.BlockSpec((tile_k, cp), lambda i, k: (k, 0)),      # x cols (message source)
                pl.BlockSpec((tile_m, tile_k), lambda i, k: (i, k)),  # adjacency tile
                pl.BlockSpec((1, cp), lambda i, k: (0, 0)),           # gamma
                pl.BlockSpec((1, cp), lambda i, k: (0, 0)),           # beta
                pl.BlockSpec((cp, cp), lambda i, k: (0, 0)),          # Linear weight (W^T)
                pl.BlockSpec((1, cp), lambda i, k: (0, 0)),           # Linear bias
                pl.BlockSpec((1, cp), lambda i, k: (0, 0)),           # (1 + eps)
            ],
            out_specs=pl.BlockSpec((tile_m, cp), lambda i, k: (i, 0)),
            scratch_shapes=[pltpu.VMEM((tile_m, cp), jnp.float32)],
        ),
        compiler_params=pltpu.CompilerParams(
            dimension_semantics=("parallel", "arbitrary"),
            vmem_limit_bytes=32 * 1024 * 1024),
        cost_estimate=cost,
    )(xp, xp, adj, gp, bp, wp, bbp, ope)

    return out[:n, :c_out]


def reference(x, edge_index, gamma, beta, w, b, eps):
    """Pure-JAX reference with the same bf16 rounding at the MXU operand
    boundaries as the kernel (f32 accumulation), matching module semantics."""
    bf = lambda a: a.astype(jnp.bfloat16).astype(jnp.float32)
    mean = jnp.mean(x, axis=-1, keepdims=True)
    var = jnp.mean((x - mean) ** 2, axis=-1, keepdims=True)
    h = (x - mean) * lax.rsqrt(var + LN_EPS) * gamma + beta
    h = jnp.maximum(h, 0.0)                       # act
    n = x.shape[0]
    adj = jnp.zeros((n, n), jnp.float32).at[edge_index[1], edge_index[0]].add(1.0)
    agg = bf(adj) @ bf(h)                         # messages relu(h_j + 0)
    z = (1.0 + eps) * h + agg
    out = bf(z) @ bf(w) + b                       # GINEConv.nn = Linear
    return out + x                                # residual (dropout = identity)


if __name__ == "__main__":
    key = jax.random.PRNGKey(0)
    N, C, E = 256, 32, 1024        # nodes, in=out channels, edges
    kx, ke, kw, kb = jax.random.split(key, 4)

    x = jax.random.normal(kx, (N, C), jnp.float32)
    edge_index = jax.random.randint(ke, (2, E), 0, N, dtype=jnp.int32)

    # Deterministic parameter init (shapes from the module's __init__).
    gamma = jnp.ones((C,), jnp.float32)                  # LayerNorm weight
    beta = jnp.zeros((C,), jnp.float32)                  # LayerNorm bias
    bound = 1.0 / math.sqrt(C)
    w = jax.random.uniform(kw, (C, C), jnp.float32, -bound, bound)  # Linear W^T
    b = jax.random.uniform(kb, (C,), jnp.float32, -bound, bound)
    eps = 0.0                                            # GINEConv train_eps init

    y = gine_layer(x, edge_index, gamma, beta, w, b, eps, num_nodes=N)
    y = jax.block_until_ready(y)

    y_ref = reference(x, edge_index, gamma, beta, w, b, eps)
    assert y.shape == (N, C)
    max_err = float(jnp.max(jnp.abs(y - y_ref)))
    assert jnp.allclose(y, y_ref, atol=1e-3, rtol=1e-3), max_err
    print("KERNEL_OK")
</pallas_src>

<mosaic_0001>
module attributes {stable_mosaic.version = 11 : i64} {
  func.func private @main(%arg0: i32) attributes {dimension_semantics = [#tpu.dimension_semantics<core_parallel>], iteration_bounds = array<i64: 2>, tpu.core_type = #tpu.core_type<sc_scalar_subcore>, window_params = []} {
    return
  }
}

module attributes {stable_mosaic.version = 11 : i64} {
  func.func private @main(%arg0: i32) attributes {dimension_semantics = [#tpu.dimension_semantics<core_parallel>], iteration_bounds = array<i64: 2>, tpu.core_type = #tpu.core_type<sc_scalar_subcore>, window_params = []} {
    return
  }
}

module attributes {stable_mosaic.version = 11 : i64} {
  func.func @gine_layer_kernel(%arg0: i32, %arg1: i32, %arg2: memref<128x128xf32, #tpu.memory_space<vmem>>, %arg3: memref<128x128xf32, #tpu.memory_space<vmem>>, %arg4: memref<128x128xbf16, #tpu.memory_space<vmem>>, %arg5: memref<1x128xf32, #tpu.memory_space<vmem>>, %arg6: memref<1x128xf32, #tpu.memory_space<vmem>>, %arg7: memref<128x128xbf16, #tpu.memory_space<vmem>>, %arg8: memref<1x128xf32, #tpu.memory_space<vmem>>, %arg9: memref<1x128xf32, #tpu.memory_space<vmem>>, %arg10: memref<128x128xf32, #tpu.memory_space<vmem>>, %arg11: memref<128x128xf32, #tpu.memory_space<vmem>>) attributes {dimension_semantics = [#tpu.dimension_semantics<parallel>, #tpu.dimension_semantics<arbitrary>], iteration_bounds = array<i64: 2, 2>, scalar_prefetch = 0 : i64, scratch_operands = 1 : i64, tpu.core_type = #tpu.core_type<tc>, window_params = [{transform_indices = @transform_0, window_bounds = array<i64: 128, 128>}, {transform_indices = @transform_1, window_bounds = array<i64: 128, 128>}, {transform_indices = @transform_2, window_bounds = array<i64: 128, 128>}, {pipeline_mode = #tpu.pipeline_mode<synchronous>, transform_indices = @transform_3, window_bounds = array<i64: 1, 128>}, {pipeline_mode = #tpu.pipeline_mode<synchronous>, transform_indices = @transform_4, window_bounds = array<i64: 1, 128>}, {pipeline_mode = #tpu.pipeline_mode<synchronous>, transform_indices = @transform_5, window_bounds = array<i64: 128, 128>}, {pipeline_mode = #tpu.pipeline_mode<synchronous>, transform_indices = @transform_6, window_bounds = array<i64: 1, 128>}, {pipeline_mode = #tpu.pipeline_mode<synchronous>, transform_indices = @transform_7, window_bounds = array<i64: 1, 128>}, {transform_indices = @transform_8, window_bounds = array<i64: 128, 128>}]} {
    %c0 = arith.constant 0 : index
    %c0_0 = arith.constant 0 : index
    %0 = vector.load %arg5[%c0, %c0_0] : memref<1x128xf32, #tpu.memory_space<vmem>>, vector<1x128xf32>
    %c0_1 = arith.constant 0 : index
    %c0_2 = arith.constant 0 : index
    %1 = vector.load %arg6[%c0_1, %c0_2] : memref<1x128xf32, #tpu.memory_space<vmem>>, vector<1x128xf32>
    %c0_i32 = arith.constant 0 : i32
    %2 = arith.cmpi eq, %arg1, %c0_i32 : i32
    %3 = arith.extui %2 : i1 to i32
    %c0_i32_3 = arith.constant 0 : i32
    %4 = arith.cmpi ne, %3, %c0_i32_3 : i32
    scf.if %4 {
      %c0_20 = arith.constant 0 : index
      %c0_21 = arith.constant 0 : index
      %42 = vector.load %arg2[%c0_20, %c0_21] : memref<128x128xf32, #tpu.memory_space<vmem>>, vector<128x128xf32>
      %43 = tpu.iota {dimensions = array<i32: 1>} : vector<128x128xi32>
      %c32_i32_22 = arith.constant 32 : i32
      %44 = vector.broadcast %c32_i32_22 : i32 to vector<128x128xi32>
      %45 = arith.cmpi slt, %43, %44 : vector<128x128xi32>
      %cst_23 = arith.constant dense<0.000000e+00> : vector<128xf32>
      %46 = vector.multi_reduction <add>, %42, %cst_23 [1] : vector<128x128xf32> to vector<128xf32>
      %47 = vector.shape_cast %46 : vector<128xf32> to vector<128x1xf32>
      %cst_24 = arith.constant 3.125000e-02 : f32
      %48 = vector.broadcast %cst_24 : f32 to vector<128x1xf32>
      %49 = arith.mulf %47, %48 : vector<128x1xf32>
      %50 = vector.broadcast %49 : vector<128x1xf32> to vector<128x128xf32>
      %51 = arith.subf %42, %50 : vector<128x128xf32>
      %cst_25 = arith.constant 0.000000e+00 : f32
      %52 = vector.broadcast %cst_25 : f32 to vector<128x128xf32>
      %53 = arith.select %45, %51, %52 : vector<128x128xi1>, vector<128x128xf32>
      %54 = arith.mulf %53, %53 : vector<128x128xf32>
      %cst_26 = arith.constant dense<0.000000e+00> : vector<128xf32>
      %55 = vector.multi_reduction <add>, %54, %cst_26 [1] : vector<128x128xf32> to vector<128xf32>
      %56 = vector.shape_cast %55 : vector<128xf32> to vector<128x1xf32>
      %cst_27 = arith.constant 3.125000e-02 : f32
      %57 = vector.broadcast %cst_27 : f32 to vector<128x1xf32>
      %58 = arith.mulf %56, %57 : vector<128x1xf32>
      %cst_28 = arith.constant 9.99999974E-6 : f32
      %59 = vector.broadcast %cst_28 : f32 to vector<128x1xf32>
      %60 = arith.addf %58, %59 : vector<128x1xf32>
      %61 = math.rsqrt %60 : vector<128x1xf32>
      %62 = vector.broadcast %61 : vector<128x1xf32> to vector<128x128xf32>
      %63 = arith.mulf %53, %62 : vector<128x128xf32>
      %64 = vector.broadcast %0 : vector<1x128xf32> to vector<128x128xf32>
      %65 = arith.mulf %63, %64 : vector<128x128xf32>
      %66 = vector.broadcast %1 : vector<1x128xf32> to vector<128x128xf32>
      %67 = arith.addf %65, %66 : vector<128x128xf32>
      %cst_29 = arith.constant 0.000000e+00 : f32
      %68 = vector.broadcast %cst_29 : f32 to vector<128x128xf32>
      %69 = arith.maximumf %67, %68 : vector<128x128xf32>
      %c0_30 = arith.constant 0 : index
      %c0_31 = arith.constant 0 : index
      %70 = vector.load %arg9[%c0_30, %c0_31] : memref<1x128xf32, #tpu.memory_space<vmem>>, vector<1x128xf32>
      %71 = vector.broadcast %70 : vector<1x128xf32> to vector<128x128xf32>
      %72 = arith.mulf %71, %69 : vector<128x128xf32>
      %c0_32 = arith.constant 0 : index
      %c0_33 = arith.constant 0 : index
      %73 = vector.load %arg11[%c0_32, %c0_33] : memref<128x128xf32, #tpu.memory_space<vmem>>, vector<128x128xf32>
      tpu.vector_store %arg11[%c0_32, %c0_33], %72 {strides = array<i32>} : memref<128x128xf32, #tpu.memory_space<vmem>>, vector<128x128xf32>,
    } else {
    }
    %c0_4 = arith.constant 0 : index
    %c0_5 = arith.constant 0 : index
    %5 = vector.load %arg3[%c0_4, %c0_5] : memref<128x128xf32, #tpu.memory_space<vmem>>, vector<128x128xf32>
    %6 = tpu.iota {dimensions = array<i32: 1>} : vector<128x128xi32>
    %c32_i32 = arith.constant 32 : i32
    %7 = vector.broadcast %c32_i32 : i32 to vector<128x128xi32>
    %8 = arith.cmpi slt, %6, %7 : vector<128x128xi32>
    %cst = arith.constant dense<0.000000e+00> : vector<128xf32>
    %9 = vector.multi_reduction <add>, %5, %cst [1] : vector<128x128xf32> to vector<128xf32>
    %10 = vector.shape_cast %9 : vector<128xf32> to vector<128x1xf32>
    %cst_6 = arith.constant 3.125000e-02 : f32
    %11 = vector.broadcast %cst_6 : f32 to vector<128x1xf32>
    %12 = arith.mulf %10, %11 : vector<128x1xf32>
    %13 = vector.broadcast %12 : vector<128x1xf32> to vector<128x128xf32>
    %14 = arith.subf %5, %13 : vector<128x128xf32>
    %cst_7 = arith.constant 0.000000e+00 : f32
    %15 = vector.broadcast %cst_7 : f32 to vector<128x128xf32>
    %16 = arith.select %8, %14, %15 : vector<128x128xi1>, vector<128x128xf32>
    %17 = arith.mulf %16, %16 : vector<128x128xf32>
    %cst_8 = arith.constant dense<0.000000e+00> : vector<128xf32>
    %18 = vector.multi_reduction <add>, %17, %cst_8 [1] : vector<128x128xf32> to vector<128xf32>
    %19 = vector.shape_cast %18 : vector<128xf32> to vector<128x1xf32>
    %cst_9 = arith.constant 3.125000e-02 : f32
    %20 = vector.broadcast %cst_9 : f32 to vector<128x1xf32>
    %21 = arith.mulf %19, %20 : vector<128x1xf32>
    %cst_10 = arith.constant 9.99999974E-6 : f32
    %22 = vector.broadcast %cst_10 : f32 to vector<128x1xf32>
    %23 = arith.addf %21, %22 : vector<128x1xf32>
    %24 = math.rsqrt %23 : vector<128x1xf32>
    %25 = vector.broadcast %24 : vector<128x1xf32> to vector<128x128xf32>
    %26 = arith.mulf %16, %25 : vector<128x128xf32>
    %27 = vector.broadcast %0 : vector<1x128xf32> to vector<128x128xf32>
    %28 = arith.mulf %26, %27 : vector<128x128xf32>
    %29 = vector.broadcast %1 : vector<1x128xf32> to vector<128x128xf32>
    %30 = arith.addf %28, %29 : vector<128x128xf32>
    %cst_11 = arith.constant 0.000000e+00 : f32
    %31 = vector.broadcast %cst_11 : f32 to vector<128x128xf32>
    %32 = arith.maximumf %30, %31 : vector<128x128xf32>
    %33 = arith.truncf %32 : vector<128x128xf32> to vector<128x128xbf16>
    %c0_12 = arith.constant 0 : index
    %c0_13 = arith.constant 0 : index
    %34 = vector.load %arg11[%c0_12, %c0_13] : memref<128x128xf32, #tpu.memory_space<vmem>>, vector<128x128xf32>
    %c0_14 = arith.constant 0 : index
    %c0_15 = arith.constant 0 : index
    %35 = vector.load %arg4[%c0_14, %c0_15] : memref<128x128xbf16, #tpu.memory_space<vmem>>, vector<128x128xbf16>
    %cst_16 = arith.constant dense<0.000000e+00> : vector<128x128xf32>
    %36 = tpu.matmul %35, %33, %cst_16 {dimension_numbers = #tpu.dot_dimension_numbers<[1], [0], [0], [1], [0, 0, 1, 1], [], []>} : vector<128x128xbf16>, vector<128x128xbf16>, vector<128x128xf32> -> vector<128x128xf32>
    %37 = arith.addf %34, %36 : vector<128x128xf32>
    %c0_17 = arith.constant 0 : index
    %c0_18 = arith.constant 0 : index
    %38 = vector.load %arg11[%c0_17, %c0_18] : memref<128x128xf32, #tpu.memory_space<vmem>>, vector<128x128xf32>
    tpu.vector_store %arg11[%c0_17, %c0_18], %37 {strides = array<i32>} : memref<128x128xf32, #tpu.memory_space<vmem>>, vector<128x128xf32>,
    %c1_i32 = arith.constant 1 : i32
    %39 = arith.cmpi eq, %arg1, %c1_i32 : i32
    %40 = arith.extui %39 : i1 to i32
    %c0_i32_19 = arith.constant 0 : i32
    %41 = arith.cmpi ne, %40, %c0_i32_19 : i32
    scf.if %41 {
      %c0_20 = arith.constant 0 : index
      %c0_21 = arith.constant 0 : index
      %42 = vector.load %arg11[%c0_20, %c0_21] : memref<128x128xf32, #tpu.memory_space<vmem>>, vector<128x128xf32>
      %43 = arith.truncf %42 : vector<128x128xf32> to vector<128x128xbf16>
      %c0_22 = arith.constant 0 : index
      %c0_23 = arith.constant 0 : index
      %44 = vector.load %arg7[%c0_22, %c0_23] : memref<128x128xbf16, #tpu.memory_space<vmem>>, vector<128x128xbf16>
      %cst_24 = arith.constant dense<0.000000e+00> : vector<128x128xf32>
      %45 = tpu.matmul %43, %44, %cst_24 {dimension_numbers = #tpu.dot_dimension_numbers<[1], [0], [0], [1], [0, 0, 1, 1], [], []>} : vector<128x128xbf16>, vector<128x128xbf16>, vector<128x128xf32> -> vector<128x128xf32>
      %c0_25 = arith.constant 0 : index
      %c0_26 = arith.constant 0 : index
      %46 = vector.load %arg8[%c0_25, %c0_26] : memref<1x128xf32, #tpu.memory_space<vmem>>, vector<1x128xf32>
      %47 = vector.broadcast %46 : vector<1x128xf32> to vector<128x128xf32>
      %48 = arith.addf %45, %47 : vector<128x128xf32>
      %c0_27 = arith.constant 0 : index
      %c0_28 = arith.constant 0 : index
      %49 = vector.load %arg2[%c0_27, %c0_28] : memref<128x128xf32, #tpu.memory_space<vmem>>, vector<128x128xf32>
      %50 = arith.addf %48, %49 : vector<128x128xf32>
      %c0_29 = arith.constant 0 : index
      %c0_30 = arith.constant 0 : index
      %51 = vector.load %arg10[%c0_29, %c0_30] : memref<128x128xf32, #tpu.memory_space<vmem>>, vector<128x128xf32>
      tpu.vector_store %arg10[%c0_29, %c0_30], %50 {strides = array<i32>} : memref<128x128xf32, #tpu.memory_space<vmem>>, vector<128x128xf32>,
    } else {
    }
    return
  }
  func.func @transform_0(%arg0: i32, %arg1: i32) -> (i32, i32) {
    %c0_i32 = arith.constant 0 : i32
    %c0_i32_0 = arith.constant 0 : i32
    return %arg0, %c0_i32 : i32, i32
  }
  func.func @transform_1(%arg0: i32, %arg1: i32) -> (i32, i32) {
    %c0_i32 = arith.constant 0 : i32
    %c0_i32_0 = arith.constant 0 : i32
    return %arg1, %c0_i32 : i32, i32
  }
  func.func @transform_2(%arg0: i32, %arg1: i32) -> (i32, i32) {
    %c0_i32 = arith.constant 0 : i32
    return %arg0, %arg1 : i32, i32
  }
  func.func @transform_3(%arg0: i32, %arg1: i32) -> (i32, i32) {
    %c0_i32 = arith.constant 0 : i32
    %c0_i32_0 = arith.constant 0 : i32
    %c0_i32_1 = arith.constant 0 : i32
    return %c0_i32, %c0_i32_0 : i32, i32
  }
  func.func @transform_4(%arg0: i32, %arg1: i32) -> (i32, i32) {
    %c0_i32 = arith.constant 0 : i32
    %c0_i32_0 = arith.constant 0 : i32
    %c0_i32_1 = arith.constant 0 : i32
    return %c0_i32, %c0_i32_0 : i32, i32
  }
  func.func @transform_5(%arg0: i32, %arg1: i32) -> (i32, i32) {
    %c0_i32 = arith.constant 0 : i32
    %c0_i32_0 = arith.constant 0 : i32
    %c0_i32_1 = arith.constant 0 : i32
    return %c0_i32, %c0_i32_0 : i32, i32
  }
  func.func @transform_6(%arg0: i32, %arg1: i32) -> (i32, i32) {
    %c0_i32 = arith.constant 0 : i32
    %c0_i32_0 = arith.constant 0 : i32
    %c0_i32_1 = arith.constant 0 : i32
    return %c0_i32, %c0_i32_0 : i32, i32
  }
  func.func @transform_7(%arg0: i32, %arg1: i32) -> (i32, i32) {
    %c0_i32 = arith.constant 0 : i32
    %c0_i32_0 = arith.constant 0 : i32
    %c0_i32_1 = arith.constant 0 : i32
    return %c0_i32, %c0_i32_0 : i32, i32
  }
  func.func @transform_8(%arg0: i32, %arg1: i32) -> (i32, i32) {
    %c0_i32 = arith.constant 0 : i32
    %c0_i32_0 = arith.constant 0 : i32
    return %arg0, %c0_i32 : i32, i32
  }
}

</mosaic_0001>

<bundles_post_ra>
// kernel: mul.1
= control target key start
LH: loop header
LB: loop body
LE: loop exit
PB: predicated region body
PF: predicated region fallthrough
CT: control target
= control target key end

     0   :  { %s20_s0 = inlined_call_operand.<no memory space> [shape: f32[], index: 0, kind: input, shape index: {}]   ;;  %s21_s1 = inlined_call_operand.vmem [shape: f32[1,128], index: 1, kind: output, shape index: {}]  }
   0x1   :  { %v2_v0 = vstv %s20_s0 }
   0x2   :  { %3 = vst [vmem:[%s21_s1] sm:$0x1] %v2_v0 }

// kernel: gine_layer.1
= control target key start
LH: loop header
LB: loop body
LE: loop exit
PB: predicated region body
PF: predicated region fallthrough
CT: control target
= control target key end

     0   :  { %s2690_s0 = inlined_call_operand.vmem [shape: f32[256,128], index: 0, kind: input, shape index: {}, may-alias: {0,1}]   ;;  %s2691_s1 = inlined_call_operand.vmem [shape: f32[256,128], index: 1, kind: input, shape index: {}, may-alias: {0,1}]   ;;  %s2692_s2 = inlined_call_operand.vmem [shape: bf16[256,256], index: 2, kind: input, shape index: {}]   ;;  %s2693_s3 = inlined_call_operand.vmem [shape: f32[1,128], index: 3, kind: input, shape index: {}]   ;;  %s2694_s4 = inlined_call_operand.vmem [shape: f32[1,128], index: 4, kind: input, shape index: {}]   ;;  %s2695_s5 = inlined_call_operand.vmem [shape: bf16[128,128], index: 5, kind: input, shape index: {}]   ;;  %s2696_s6 = inlined_call_operand.vmem [shape: f32[1,128], index: 6, kind: input, shape index: {}]   ;;  %s2697_s7 = inlined_call_operand.vmem [shape: f32[1,128], index: 7, kind: input, shape index: {}]   ;;  %s2698_s8 = inlined_call_operand.vmem [shape: f32[256,128], index: 8, kind: output, shape index: {}]  }
   0x1   :  { %2699 = sst [smem:[#allocation4_spill]] %s2692_s2 }
   0x2   :  { %s2025_s27 = smov 0   ;;  %s2027_s28 = smov 0  }
   0x3   :  { %s2029_s29 = smov 0   ;;  %s2031_s30 = smov 0  }
   0x4   :  { %s2033_s9 = smov 0   ;;  %s2035_s10 = smov 0  }
   0x5   :  { %s2037_s11 = smov 0  }
   0x6 LB: > { %s27_s12 = sadd.s32 1, %s1970_s9  ;;  %s30_s13 = sadd.s32 1, %s1974_s10  ;;  %s1978_s11 = sphi %s2037_s11, %s18_s11   ;;  %s1974_s10 = sphi %s2035_s10, %s2706_s10   ;;  %s1970_s9 = sphi %s2033_s9, %s2705_s9   ;;  %s1966_s30 = sphi %s2031_s30, %s2704_s30   ;;  %s1962_s29 = sphi %s2029_s29, %s2703_s29   ;;  %s1958_s28 = sphi %s2027_s28, %s2702_s28   ;;  %s1954_s27 = sphi %s2025_s27, %s2701_s27  }
   0x7   : > { %p28_p0 = scmp.ge.s32.totalorder %s27_s12, 2  ;;  %p98_p1 = scmp.ne.s32.totalorder %s1958_s28, %s1954_s27 }
   0x8   : > { %p99_p2 = scmp.eq.s32.totalorder %s1978_s11, 0  ;;  %s91_s17 = sadd.s32 1, %s1958_s28 }
   0x9   : > { %s2708_s12 = smov (%p28_p0, %s27_s12), 0  ;;  %s2710_s13 = smov (!%p28_p0, %s30_s13), %s1974_s10 }
   0xa   : > { %p100_p3 = por %p99_p2, %p98_p1  ;;  %p32_p4 = scmp.ge.s32.totalorder %s2710_s13, 2 }
   0xb   : > { %s87_s14 = ssub.s32 %s1970_s9, %s2708_s12  ;;  %p1624_p6 = scmp.ge.s32.totalorder %s1978_s11, 4 }
   0xc   : > { %s2712_s13 = smov (%p32_p4, %s2710_s13), 0 }
   0xd   : > { %s86_s15 = ssub.s32 %s1974_s10, %s2712_s13  ;;  %270 = sbr.rel (%p1624_p6) target bundleno = 38 (0x26), region = 36 }
   0xe   : > { %s88_s16 = sor.u32 %s87_s14, %s86_s15 }
   0xf   : > { %p89_p5 = scmp.eq.s32.totalorder %s88_s16, 0 }
  0x11   : > { %s2076_s18 = scalar_select %p89_p5, %s1958_s28, %s91_s17  }
  0x12   : > { %291 = sbr.rel (!%p100_p3) target bundleno = 38 (0x26), region = 48  ;;  %s293_s19 = sand.u32 (%p100_p3), 1, %s1958_s28  }
  0x13   : > { %s1659_s20 = sshll.u32 (%p100_p3), %s1974_s10, 5  ;;  %s1625_s21 = sshll.u32 (%p100_p3), %s293_s19, 6 }
  0x14   : > { %s298_s22 = sadd.s32 (%p100_p3), %s1970_s9, %s1659_s20  ;;  %s2700_s2 = sld [smem:[#allocation4_spill]] (%p100_p3) }
  0x15   : > { %s1628_s23 = sshll.u32 (%p100_p3), %s298_s22, 2  ;;  %s295_s14 = scalar_lea.vmem (%p100_p3), [#allocation3], %s1625_s21 }
  0x1a   : > { %s2085_s26 = scalar_lea.vmem %s2700_s2, %s1628_s23 }
  0x1b   : > { %v317_v0 = vld [vmem:[%s2085_s26] sm:$0xf]  ;;  %v319_v1 = vld [vmem:[%s2085_s26 + $0x8] sm:$0xf]  ;;  %v321_v2 = vld [vmem:[%s2085_s26 + $0x10] sm:$0xf] }
  0x1c   : > { %318 = vst [vmem:[%s295_s14] sm:$0xf] %v317_v0  ;;  %320 = vst [vmem:[%s295_s14 + $0x4] sm:$0xf] %v319_v1  ;;  %v323_v3 = vld [vmem:[%s2085_s26 + $0x18] sm:$0xf] }
  0x1d   : > { %322 = vst [vmem:[%s295_s14 + $0x8] sm:$0xf] %v321_v2  ;;  %v325_v4 = vld [vmem:[%s2085_s26 + $0x20] sm:$0xf]  ;;  %v327_v5 = vld [vmem:[%s2085_s26 + $0x28] sm:$0xf] }
  0x1e   : > { %324 = vst [vmem:[%s295_s14 + $0xc] sm:$0xf] %v323_v3  ;;  %326 = vst [vmem:[%s295_s14 + $0x10] sm:$0xf] %v325_v4  ;;  %v329_v6 = vld [vmem:[%s2085_s26 + $0x30] sm:$0xf] }
  0x1f   : > { %328 = vst [vmem:[%s295_s14 + $0x14] sm:$0xf] %v327_v5  ;;  %v331_v7 = vld [vmem:[%s2085_s26 + $0x38] sm:$0xf]  ;;  %v333_v8 = vld [vmem:[%s2085_s26 + $0x40] sm:$0xf] }
  0x20   : > { %330 = vst [vmem:[%s295_s14 + $0x18] sm:$0xf] %v329_v6  ;;  %332 = vst [vmem:[%s295_s14 + $0x1c] sm:$0xf] %v331_v7  ;;  %v335_v9 = vld [vmem:[%s2085_s26 + $0x48] sm:$0xf] }
  0x21   : > { %334 = vst [vmem:[%s295_s14 + $0x20] sm:$0xf] %v333_v8  ;;  %v337_v10 = vld [vmem:[%s2085_s26 + $0x50] sm:$0xf]  ;;  %v339_v11 = vld [vmem:[%s2085_s26 + $0x58] sm:$0xf] }
  0x22   : > { %336 = vst [vmem:[%s295_s14 + $0x24] sm:$0xf] %v335_v9  ;;  %338 = vst [vmem:[%s295_s14 + $0x28] sm:$0xf] %v337_v10  ;;  %v341_v12 = vld [vmem:[%s2085_s26 + $0x60] sm:$0xf] }
  0x23   : > { %340 = vst [vmem:[%s295_s14 + $0x2c] sm:$0xf] %v339_v11  ;;  %v343_v13 = vld [vmem:[%s2085_s26 + $0x68] sm:$0xf]  ;;  %v345_v14 = vld [vmem:[%s2085_s26 + $0x70] sm:$0xf] }
  0x24   : > { %342 = vst [vmem:[%s295_s14 + $0x30] sm:$0xf] %v341_v12  ;;  %344 = vst [vmem:[%s295_s14 + $0x34] sm:$0xf] %v343_v13  ;;  %v347_v15 = vld [vmem:[%s2085_s26 + $0x78] sm:$0xf] }
  0x25   : > { %346 = vst [vmem:[%s295_s14 + $0x38] sm:$0xf] %v345_v14  ;;  %348 = vst [vmem:[%s295_s14 + $0x3c] sm:$0xf] %v347_v15 }
  0x26 PF: > { %p1629_p7 = scmp.ge.s32.totalorder %s1978_s11, 1  ;;  %p403_p8 = scmp.lt.s32.totalorder %s1978_s11, 5 }
  0x28   : > { %p404_p9 = pnand %p1629_p7, %p403_p8 }
  0x29   : > { %s410_s15 = sand.u32 (!%p404_p9), 1, %s1954_s27   ;;  %s1631_s16 = sshll.u32 (!%p404_p9), %s1966_s30, 4 }
  0x2a   : > { %407 = sbr.rel (%p404_p9) target bundleno = 1204 (0x4b4), region = 89  ;;  %s1630_s22 = sshll.u32 (!%p404_p9), %s410_s15, 6 }
  0x2b   : > { %p454_p10 = scmp.lt.s32.totalorder (!%p404_p9), %s1631_s16, 31  ;;  %s1633_s23 = sshll.u32 (!%p404_p9), %s1962_s29, 4 }
  0x2c   : > { %p460_p11 = scmp.lt.s32.totalorder (!%p404_p9), %s1633_s23, 31  ;;  %s2133_s2 = scalar_lea.vmem (!%p404_p9), [#allocation3], %s1630_s22 }
  0x2d   : > { %p1637_p12 = scmp.ne.s32.totalorder (!%p404_p9), %s1962_s29, 0 }
  0x2f   : > { %v2110_v16 = vld [vmem:[%s2693_s3] sm:$0x1]  ;;  %s2714_s16 = smov (!%p454_p10, %s1631_s16), 31  ;;  %s2716_s23 = smov (!%p460_p11, %s1633_s23), 31 }
  0x30   : > { %v2115_v17 = vld [vmem:[%s2694_s4] sm:$0x1]  ;;  %s1632_s24 = sshll.u32 %s2714_s16, 3  ;;  %s1634_s19 = sshll.u32 %s2716_s23, 3 }
  0x31   : > { %s2121_s27 = scalar_lea.vmem %s2690_s0, %s1632_s24  ;;  %s2126_s17 = scalar_lea.vmem %s2698_s8, %s1632_s24 }
  0x32   : > { %s2131_s15 = scalar_lea.vmem %s2691_s1, %s1634_s19  ;;  %478 = sbr.rel (%p1637_p12) target bundleno = 400 (0x190), region = 97 }
  0x37   : > { %v479_v18 = vld [vmem:[%s2121_s27] sm:$0xff]  ;;  %v481_v19 = vld [vmem:[%s2121_s27 + $0x10] sm:$0xff]  ;;  %v480_v20 = vld [vmem:[%s2121_s27 + $0x8] sm:$0xff]  ;;  %v495_v34 = vlaneseq }
  0x38   : > { %498 = vadd.xlane.f32.xlu0 %v479_v18  ;;  %502 = vadd.xlane.f32.xlu1 %v481_v19  ;;  %v482_v21 = vld [vmem:[%s2121_s27 + $0x18] sm:$0xff]  ;;  %v483_v22 = vld [vmem:[%s2121_s27 + $0x20] sm:$0xff]  ;;  %v484_v23 = vld [vmem:[%s2121_s27 + $0x28] sm:$0xff] }
  0x39   : > { %v2143_v24 = vld [vmem:[%s2121_s27 + $0x30] sm:$0xff]  ;;  %v2146_v25 = vld [vmem:[%s2121_s27 + $0x38] sm:$0xff]  ;;  %v2151_v26 = vld [vmem:[%s2121_s27 + $0x40] sm:$0xff]  ;;  %v2183_v35 = vand.u32 127, %v495_v34 }
  0x3a   : > { %v2154_v27 = vld [vmem:[%s2121_s27 + $0x48] sm:$0xff]  ;;  %v2159_v28 = vld [vmem:[%s2121_s27 + $0x50] sm:$0xff]  ;;  %v2162_v29 = vld [vmem:[%s2121_s27 + $0x58] sm:$0xff] }
  0x3b   : > { %v2167_v30 = vld [vmem:[%s2121_s27 + $0x60] sm:$0xff]  ;;  %v2170_v31 = vld [vmem:[%s2121_s27 + $0x68] sm:$0xff]  ;;  %v2175_v32 = vld [vmem:[%s2121_s27 + $0x70] sm:$0xff]  ;;  %vm497_vm0 = vcmp.lt.s32.totalorder %v2183_v35, 32 }
  0x3c   : > { %500 = vadd.xlane.f32.xlu0 %v480_v20  ;;  %504 = vadd.xlane.f32.xlu1 %v482_v21  ;;  %v2178_v33 = vld [vmem:[%s2121_s27 + $0x78] sm:$0xff] }
  0x40   : > { %506 = vadd.xlane.f32.xlu0 %v483_v22  ;;  %508 = vadd.xlane.f32.xlu1 %v484_v23 }
  0x44   : > { %510 = vadd.xlane.f32.xlu0 %v2143_v24  ;;  %512 = vadd.xlane.f32.xlu1 %v2146_v25 }
  0x48   : > { %514 = vadd.xlane.f32.xlu0 %v2151_v26  ;;  %516 = vadd.xlane.f32.xlu1 %v2154_v27 }
  0x4c   : > { %518 = vadd.xlane.f32.xlu0 %v2159_v28  ;;  %520 = vadd.xlane.f32.xlu1 %v2162_v29 }
  0x50   : > { %522 = vadd.xlane.f32.xlu0 %v2167_v30  ;;  %524 = vadd.xlane.f32.xlu1 %v2170_v31 }
  0x54   : > { %526 = vadd.xlane.f32.xlu0 %v2175_v32  ;;  %528 = vadd.xlane.f32.xlu1 %v2178_v33 }
  0xc1   : > { %v499_v36 = vpop.xlane.xlu0 %498  ;;  %v503_v37 = vpop.xlane.xlu1 %502 }
  0xc2   : > { %v530_v38 = vmul.f32 0.03125, %v499_v36  ;;  %v532_v39 = vmul.f32 0.03125, %v503_v37 }
  0xc4   : > { %v546_v40 = vsub.f32 %v479_v18, %v530_v38  ;;  %v548_v41 = vsub.f32 %v481_v19, %v532_v39 }
  0xc5   : > { %v501_v42 = vpop.xlane.xlu0 %500  ;;  %v505_v43 = vpop.xlane.xlu1 %504 }
  0xc6   : > { %v531_v44 = vmul.f32 0.03125, %v501_v42  ;;  %v533_v45 = vmul.f32 0.03125, %v505_v43  ;;  %v2188_v46 = vsel %vm497_vm0, %v546_v40, 0.0  ;;  %v2192_v47 = vsel %vm497_vm0, %v548_v41, 0.0 }
  0xc7   : > { %v578_v48 = vmul.f32 %v2188_v46, %v2188_v46  ;;  %v580_v53 = vmul.f32 %v2192_v47, %v2192_v47 }
  0xc8   : > { %v547_v49 = vsub.f32 %v480_v20, %v531_v44  ;;  %v549_v50 = vsub.f32 %v482_v21, %v533_v45 }
  0xc9   : > { %594 = vadd.xlane.f32.xlu0 %v578_v48  ;;  %v507_v51 = vpop.xlane.xlu0 %506  ;;  %v509_v52 = vpop.xlane.xlu1 %508 }
  0xca   : > { %v534_v54 = vmul.f32 0.03125, %v507_v51  ;;  %v535_v55 = vmul.f32 0.03125, %v509_v52  ;;  %v2200_v56 = vsel %vm497_vm0, %v547_v49, 0.0  ;;  %v2204_v57 = vsel %vm497_vm0, %v549_v50, 0.0 }
  0xcb   : > { %v579_v58 = vmul.f32 %v2200_v56, %v2200_v56  ;;  %v581_v63 = vmul.f32 %v2204_v57, %v2204_v57 }
  0xcc   : > { %v550_v59 = vsub.f32 %v483_v22, %v534_v54  ;;  %v551_v60 = vsub.f32 %v484_v23, %v535_v55 }
  0xcd   : > { %598 = vadd.xlane.f32.xlu0 %v580_v53  ;;  %596 = vadd.xlane.f32.xlu1 %v579_v58  ;;  %v511_v61 = vpop.xlane.xlu0 %510  ;;  %v513_v62 = vpop.xlane.xlu1 %512 }
  0xce   : > { %v536_v0 = vmul.f32 0.03125, %v511_v61  ;;  %v537_v1 = vmul.f32 0.03125, %v513_v62  ;;  %v2212_v2 = vsel %vm497_vm0, %v550_v59, 0.0  ;;  %v2216_v3 = vsel %vm497_vm0, %v551_v60, 0.0 }
  0xcf   : > { %v582_v4 = vmul.f32 %v2212_v2, %v2212_v2  ;;  %v583_v9 = vmul.f32 %v2216_v3, %v2216_v3 }
  0xd0   : > { %v552_v5 = vsub.f32 %v2143_v24, %v536_v0  ;;  %v553_v6 = vsub.f32 %v2146_v25, %v537_v1 }
  0xd1   : > { %600 = vadd.xlane.f32.xlu1 %v581_v63  ;;  %602 = vadd.xlane.f32.xlu0 %v582_v4  ;;  %v515_v7 = vpop.xlane.xlu0 %514  ;;  %v517_v8 = vpop.xlane.xlu1 %516 }
  0xd2   : > { %v538_v10 = vmul.f32 0.03125, %v515_v7  ;;  %v539_v11 = vmul.f32 0.03125, %v517_v8  ;;  %v2226_v12 = vsel %vm497_vm0, %v552_v5, 0.0  ;;  %v2230_v13 = vsel %vm497_vm0, %v553_v6, 0.0 }
  0xd3   : > { %v584_v14 = vmul.f32 %v2226_v12, %v2226_v12  ;;  %v585_v21 = vmul.f32 %v2230_v13, %v2230_v13  ;;  %v692_v8 = vshrl.u32 %v495_v34, 7 }
  0xd4   : > { %v554_v15 = vsub.f32 %v2151_v26, %v538_v10  ;;  %v555_v18 = vsub.f32 %v2154_v27, %v539_v11 }
  0xd5   : > { %604 = vadd.xlane.f32.xlu1 %v583_v9  ;;  %606 = vadd.xlane.f32.xlu0 %v584_v14  ;;  %v519_v19 = vpop.xlane.xlu0 %518  ;;  %v521_v20 = vpop.xlane.xlu1 %520 }
  0xd6   : > { %v540_v22 = vmul.f32 0.03125, %v519_v19  ;;  %v541_v23 = vmul.f32 0.03125, %v521_v20  ;;  %v2240_v24 = vsel %vm497_vm0, %v554_v15, 0.0  ;;  %v2244_v25 = vsel %vm497_vm0, %v555_v18, 0.0 }
  0xd7   : > { %v586_v26 = vmul.f32 %v2240_v24, %v2240_v24  ;;  %v587_v39 = vmul.f32 %v2244_v25, %v2244_v25  ;;  %v693_v19 = vsub.s32 0, %v692_v8 }
  0xd8   : > { %v556_v27 = vsub.f32 %v2159_v28, %v540_v22  ;;  %v557_v36 = vsub.f32 %v2162_v29, %v541_v23 }
  0xd9   : > { %608 = vadd.xlane.f32.xlu1 %v585_v21  ;;  %610 = vadd.xlane.f32.xlu0 %v586_v26  ;;  %v523_v37 = vpop.xlane.xlu0 %522  ;;  %v525_v38 = vpop.xlane.xlu1 %524 }
  0xda   : > { %v542_v40 = vmul.f32 0.03125, %v523_v37  ;;  %v543_v41 = vmul.f32 0.03125, %v525_v38  ;;  %v2254_v42 = vsel %vm497_vm0, %v556_v27, 0.0  ;;  %v2258_v43 = vsel %vm497_vm0, %v557_v36, 0.0 }
  0xdb   : > { %v588_v28 = vmul.f32 %v2254_v42, %v2254_v42  ;;  %v589_v49 = vmul.f32 %v2258_v43, %v2258_v43  ;;  %v2294_v36 = vrot.slane %v2110_v16, %v693_v19 }
  0xdc   : > { %v558_v29 = vsub.f32 %v2167_v30, %v542_v40  ;;  %v559_v44 = vsub.f32 %v2170_v31, %v543_v41 }
  0xdd   : > { %612 = vadd.xlane.f32.xlu1 %v587_v39  ;;  %614 = vadd.xlane.f32.xlu0 %v588_v28  ;;  %v527_v45 = vpop.xlane.xlu0 %526  ;;  %v529_v48 = vpop.xlane.xlu1 %528  ;;  %v2297_v39 = vrot.slane %v2115_v17, %v693_v19 }
  0xde   : > { %v544_v50 = vmul.f32 0.03125, %v527_v45  ;;  %v545_v51 = vmul.f32 0.03125, %v529_v48  ;;  %v2268_v52 = vsel %vm497_vm0, %v558_v29, 0.0  ;;  %v2272_v53 = vsel %vm497_vm0, %v559_v44, 0.0 }
  0xdf   : > { %v590_v30 = vmul.f32 %v2268_v52, %v2268_v52  ;;  %v591_v55 = vmul.f32 %v2272_v53, %v2272_v53 }
  0xe0   : > { %v560_v31 = vsub.f32 %v2175_v32, %v544_v50  ;;  %v561_v54 = vsub.f32 %v2178_v33, %v545_v51 }
  0xe1   : > { %616 = vadd.xlane.f32.xlu1 %v589_v49  ;;  %618 = vadd.xlane.f32.xlu0 %v590_v30 }
  0xe2   : > { %v2282_v58 = vsel %vm497_vm0, %v560_v31, 0.0  ;;  %v2286_v59 = vsel %vm497_vm0, %v561_v54, 0.0 }
  0xe3   : > { %v592_v60 = vmul.f32 %v2282_v58, %v2282_v58  ;;  %v593_v32 = vmul.f32 %v2286_v59, %v2286_v59 }
  0xe5   : > { %620 = vadd.xlane.f32.xlu1 %v591_v55  ;;  %622 = vadd.xlane.f32.xlu0 %v592_v60 }
  0xe9   : > { %624 = vadd.xlane.f32.xlu1 %v593_v32 }
 0x152   : > { %v595_v33 = vpop.xlane.xlu0 %594 }
 0x153   : > { %v626_v61 = vmul.f32 0.03125, %v595_v33 }
 0x155   : > { %v642_v62 = vadd.f32 1e-05, %v626_v61 }
 0x156   : > { %v597_v63 = vpop.xlane.xlu1 %596  ;;  %v599_v0 = vpop.xlane.xlu0 %598 }
 0x157   : > { %1844 = vrsqrt.f32 %v642_v62  ;;  %v627_v1 = vmul.f32 0.03125, %v597_v63  ;;  %v628_v4 = vmul.f32 0.03125, %v599_v0 }
 0x159   : > { %v643_v35 = vadd.f32 1e-05, %v627_v1  ;;  %v644_v5 = vadd.f32 1e-05, %v628_v4 }
 0x15a   : > { %v601_v6 = vpop.xlane.xlu1 %600  ;;  %v603_v7 = vpop.xlane.xlu0 %602 }
 0x15b   : > { %1846 = vrsqrt.f32 %v643_v35  ;;  %v629_v9 = vmul.f32 0.03125, %v601_v6  ;;  %v630_v10 = vmul.f32 0.03125, %v603_v7 }
 0x15c   : > { %1848 = vrsqrt.f32 %v644_v5 }
 0x15d   : > { %v645_v11 = vadd.f32 1e-05, %v629_v9  ;;  %v646_v14 = vadd.f32 1e-05, %v630_v10 }
 0x15e   : > { %v605_v15 = vpop.xlane.xlu1 %604  ;;  %v607_v18 = vpop.xlane.xlu0 %606 }
 0x15f   : > { %1850 = vrsqrt.f32 %v645_v11  ;;  %v631_v20 = vmul.f32 0.03125, %v605_v15  ;;  %v632_v21 = vmul.f32 0.03125, %v607_v18 }
 0x160   : > { %1852 = vrsqrt.f32 %v646_v14 }
 0x161   : > { %v647_v22 = vadd.f32 1e-05, %v631_v20  ;;  %v648_v23 = vadd.f32 1e-05, %v632_v21 }
 0x162   : > { %v609_v26 = vpop.xlane.xlu1 %608  ;;  %v611_v27 = vpop.xlane.xlu0 %610 }
 0x163   : > { %1854 = vrsqrt.f32 %v647_v22  ;;  %v633_v34 = vmul.f32 0.03125, %v609_v26  ;;  %v634_v37 = vmul.f32 0.03125, %v611_v27 }
 0x164   : > { %v1845_v38 = vpop.eup %1844  ;;  %1856 = vrsqrt.f32 %v648_v23 }
 0x165   : > { %v674_v40 = vmul.f32 %v1845_v38, %v2188_v46  ;;  %v649_v41 = vadd.f32 1e-05, %v633_v34  ;;  %v650_v28 = vadd.f32 1e-05, %v634_v37  ;;  %v2306_v46 = vld [vmem:[%s2697_s7] ss:$0 sm:$0xff] }
 0x166   : > { %v613_v29 = vpop.xlane.xlu1 %612  ;;  %v615_v44 = vpop.xlane.xlu0 %614 }
 0x167   : > { %v696_v45 = vmul.f32 %v2294_v36, %v674_v40  ;;  %1858 = vrsqrt.f32 %v649_v41  ;;  %v635_v48 = vmul.f32 0.03125, %v613_v29  ;;  %v636_v49 = vmul.f32 0.03125, %v615_v44 }
 0x168   : > { %v1847_v50 = vpop.eup %1846  ;;  %1860 = vrsqrt.f32 %v650_v28 }
 0x169   : > { %v1849_v51 = vpop.eup %1848  ;;  %v718_v30 = vadd.f32 %v2297_v39, %v696_v45  ;;  %v675_v31 = vmul.f32 %v1847_v50, %v2200_v56  ;;  %v651_v54 = vadd.f32 1e-05, %v635_v48  ;;  %v652_v55 = vadd.f32 1e-05, %v636_v49 }
 0x16a   : > { %v676_v60 = vmul.f32 %v1849_v51, %v2192_v47  ;;  %v617_v32 = vpop.xlane.xlu1 %616  ;;  %v619_v33 = vpop.xlane.xlu0 %618 }
 0x16b   : > { %v734_v61 = vmax.f32 %v718_v30, 0.0  ;;  %v697_v62 = vmul.f32 %v2294_v36, %v675_v31  ;;  %1862 = vrsqrt.f32 %v651_v54  ;;  %v637_v63 = vmul.f32 0.03125, %v617_v32 }
 0x16c   : > { %v1851_v0 = vpop.eup %1850  ;;  %v698_v1 = vmul.f32 %v2294_v36, %v676_v60  ;;  %1864 = vrsqrt.f32 %v652_v55  ;;  %v638_v56 = vmul.f32 0.03125, %v619_v33 }
 0x16d   : > { %v1853_v4 = vpop.eup %1852  ;;  %v757_v35 = vmul.f32 %v2306_v46, %v734_v61  ;;  %v719_v5 = vadd.f32 %v2297_v39, %v697_v62  ;;  %v677_v6 = vmul.f32 %v1851_v0, %v2204_v57  ;;  %v653_v47 = vadd.f32 1e-05, %v637_v63 }
 0x16e   : > { %v720_v7 = vadd.f32 %v2297_v39, %v698_v1  ;;  %v678_v8 = vmul.f32 %v1853_v4, %v2212_v2  ;;  %v654_v9 = vadd.f32 1e-05, %v638_v56  ;;  %v621_v10 = vpop.xlane.xlu1 %620  ;;  %v623_v11 = vpop.xlane.xlu0 %622 }
 0x16f   : > { %773 = vst [vmem:[#allocation2 + $0x30] sm:$0xff] %v757_v35  ;;  %v735_v14 = vmax.f32 %v719_v5, 0.0  ;;  %v699_v15 = vmul.f32 %v2294_v36, %v677_v6  ;;  %1866 = vrsqrt.f32 %v653_v47  ;;  %v639_v18 = vmul.f32 0.03125, %v621_v10 }
 0x170   : > { %v1855_v19 = vpop.eup %1854  ;;  %v736_v20 = vmax.f32 %v720_v7, 0.0  ;;  %v700_v21 = vmul.f32 %v2294_v36, %v678_v8  ;;  %1868 = vrsqrt.f32 %v654_v9  ;;  %v640_v57 = vmul.f32 0.03125, %v623_v11 }
 0x171   : > { %v1857_v22 = vpop.eup %1856  ;;  %v758_v23 = vmul.f32 %v2306_v46, %v735_v14  ;;  %v721_v2 = vadd.f32 %v2297_v39, %v699_v15  ;;  %v679_v26 = vmul.f32 %v1855_v19, %v2216_v3  ;;  %v655_v27 = vadd.f32 1e-05, %v639_v18 }
 0x172   : > { %v759_v34 = vmul.f32 %v2306_v46, %v736_v20  ;;  %v722_v37 = vadd.f32 %v2297_v39, %v700_v21  ;;  %v680_v38 = vmul.f32 %v1857_v22, %v2226_v12  ;;  %v656_v40 = vadd.f32 1e-05, %v640_v57  ;;  %v625_v41 = vpop.xlane.xlu1 %624 }
 0x173   : > { %774 = vst [vmem:[#allocation2] sm:$0xff] %v758_v23  ;;  %v737_v28 = vmax.f32 %v721_v2, 0.0  ;;  %v701_v29 = vmul.f32 %v2294_v36, %v679_v26  ;;  %1870 = vrsqrt.f32 %v655_v27  ;;  %v641_v44 = vmul.f32 0.03125, %v625_v41 }
 0x174   : > { %v1859_v45 = vpop.eup %1858  ;;  %775 = vst [vmem:[#allocation2 + $0x58] sm:$0xff] %v759_v34  ;;  %v738_v48 = vmax.f32 %v722_v37, 0.0  ;;  %v702_v3 = vmul.f32 %v2294_v36, %v680_v38  ;;  %1872 = vrsqrt.f32 %v656_v40 }
 0x175   : > { %v1861_v49 = vpop.eup %1860  ;;  %v760_v50 = vmul.f32 %v2306_v46, %v737_v28  ;;  %v723_v51 = vadd.f32 %v2297_v39, %v701_v29  ;;  %v681_v12 = vmul.f32 %v1859_v45, %v2230_v13  ;;  %v657_v30 = vadd.f32 1e-05, %v641_v44 }
 0x176   : > { %v761_v31 = vmul.f32 %v2306_v46, %v738_v48  ;;  %v724_v54 = vadd.f32 %v2297_v39, %v702_v3  ;;  %v682_v55 = vmul.f32 %v1861_v49, %v2240_v24 }
 0x177   : > { %776 = vst [vmem:[#allocation2 + $0x18] sm:$0xff] %v760_v50  ;;  %v739_v60 = vmax.f32 %v723_v51, 0.0  ;;  %v703_v32 = vmul.f32 %v2294_v36, %v681_v12  ;;  %1874 = vrsqrt.f32 %v657_v30 }
 0x178   : > { %v1863_v33 = vpop.eup %1862  ;;  %777 = vst [vmem:[#allocation2 + $0x50] sm:$0xff] %v761_v31  ;;  %v740_v61 = vmax.f32 %v724_v54, 0.0  ;;  %v704_v62 = vmul.f32 %v2294_v36, %v682_v55 }
 0x179   : > { %v1865_v63 = vpop.eup %1864  ;;  %v762_v13 = vmul.f32 %v2306_v46, %v739_v60  ;;  %v725_v0 = vadd.f32 %v2297_v39, %v703_v32  ;;  %v683_v1 = vmul.f32 %v1863_v33, %v2244_v25 }
 0x17a   : > { %v763_v56 = vmul.f32 %v2306_v46, %v740_v61  ;;  %v726_v24 = vadd.f32 %v2297_v39, %v704_v62  ;;  %v684_v4 = vmul.f32 %v1865_v63, %v2254_v42 }
 0x17b   : > { %778 = vst [vmem:[#allocation2 + $0x68] sm:$0xff] %v762_v13  ;;  %v741_v35 = vmax.f32 %v725_v0, 0.0  ;;  %v705_v5 = vmul.f32 %v2294_v36, %v683_v1 }
 0x17c   : > { %v1867_v6 = vpop.eup %1866  ;;  %779 = vst [vmem:[#allocation2 + $0x8] sm:$0xff] %v763_v56  ;;  %v742_v47 = vmax.f32 %v726_v24, 0.0  ;;  %v706_v7 = vmul.f32 %v2294_v36, %v684_v4 }
 0x17d   : > { %v1869_v8 = vpop.eup %1868  ;;  %v764_v9 = vmul.f32 %v2306_v46, %v741_v35  ;;  %v727_v25 = vadd.f32 %v2297_v39, %v705_v5  ;;  %v685_v10 = vmul.f32 %v1867_v6, %v2258_v43 }
 0x17e   : > { %v765_v11 = vmul.f32 %v2306_v46, %v742_v47  ;;  %v728_v42 = vadd.f32 %v2297_v39, %v706_v7  ;;  %v686_v14 = vmul.f32 %v1869_v8, %v2268_v52 }
 0x17f   : > { %780 = vst [vmem:[#allocation2 + $0x48] sm:$0xff] %v764_v9  ;;  %v743_v15 = vmax.f32 %v727_v25, 0.0  ;;  %v707_v18 = vmul.f32 %v2294_v36, %v685_v10 }
 0x180   : > { %v1871_v19 = vpop.eup %1870  ;;  %781 = vst [vmem:[#allocation2 + $0x40] sm:$0xff] %v765_v11  ;;  %v744_v20 = vmax.f32 %v728_v42, 0.0  ;;  %v708_v21 = vmul.f32 %v2294_v36, %v686_v14 }
 0x181   : > { %v1873_v57 = vpop.eup %1872  ;;  %v766_v22 = vmul.f32 %v2306_v46, %v743_v15  ;;  %v729_v43 = vadd.f32 %v2297_v39, %v707_v18  ;;  %v687_v23 = vmul.f32 %v1871_v19, %v2272_v53 }
 0x182   : > { %v767_v2 = vmul.f32 %v2306_v46, %v744_v20  ;;  %v730_v52 = vadd.f32 %v2297_v39, %v708_v21  ;;  %v688_v26 = vmul.f32 %v1873_v57, %v2282_v58 }
 0x183   : > { %782 = vst [vmem:[#allocation2 + $0x20] sm:$0xff] %v766_v22  ;;  %v745_v27 = vmax.f32 %v729_v43, 0.0  ;;  %v709_v34 = vmul.f32 %v2294_v36, %v687_v23 }
 0x184   : > { %v1875_v37 = vpop.eup %1874  ;;  %783 = vst [vmem:[#allocation2 + $0x10] sm:$0xff] %v767_v2  ;;  %v746_v38 = vmax.f32 %v730_v52, 0.0  ;;  %v710_v40 = vmul.f32 %v2294_v36, %v688_v26 }
 0x185   : > { %v768_v41 = vmul.f32 %v2306_v46, %v745_v27  ;;  %v731_v28 = vadd.f32 %v2297_v39, %v709_v34  ;;  %v689_v53 = vmul.f32 %v1875_v37, %v2286_v59 }
 0x186   : > { %v769_v29 = vmul.f32 %v2306_v46, %v746_v38  ;;  %v732_v44 = vadd.f32 %v2297_v39, %v710_v40 }
 0x187   : > { %784 = vst [vmem:[#allocation2 + $0x38] sm:$0xff] %v768_v41  ;;  %v747_v58 = vmax.f32 %v731_v28, 0.0  ;;  %v711_v45 = vmul.f32 %v2294_v36, %v689_v53 }
 0x188   : > { %785 = vst [vmem:[#allocation2 + $0x60] sm:$0xff] %v769_v29  ;;  %v748_v48 = vmax.f32 %v732_v44, 0.0 }
 0x189   : > { %v770_v3 = vmul.f32 %v2306_v46, %v747_v58  ;;  %v733_v49 = vadd.f32 %v2297_v39, %v711_v45 }
 0x18a   : > { %v771_v50 = vmul.f32 %v2306_v46, %v748_v48 }
 0x18b   : > { %786 = vst [vmem:[#allocation2 + $0x70] sm:$0xff] %v770_v3  ;;  %v749_v51 = vmax.f32 %v733_v49, 0.0 }
 0x18c   : > { %787 = vst [vmem:[#allocation2 + $0x78] sm:$0xff] %v771_v50 }
 0x18d   : > { %v772_v59 = vmul.f32 %v2306_v46, %v749_v51 }
 0x18f   : > { %788 = vst [vmem:[#allocation2 + $0x28] sm:$0xff] %v772_v59 }
 0x190 PF: > { %v803_v36 = vld [vmem:[%s2131_s15 + $0x70] sm:$0xff]  ;;  %v801_v39 = vld [vmem:[%s2131_s15 + $0x60] sm:$0xff]  ;;  %v804_v12 = vld [vmem:[%s2131_s15 + $0x78] sm:$0xff]  ;;  %v805_v1 = vlaneseq  ;;  %p1647_p13 = scmp.ne.s32.totalorder %s1962_s29, 1 }
 0x191   : > { %836 = vadd.xlane.f32.xlu0 %v803_v36  ;;  %832 = vadd.xlane.f32.xlu1 %v801_v39  ;;  %v802_v30 = vld [vmem:[%s2131_s15 + $0x68] sm:$0xff]  ;;  %v2373_v46 = vld [vmem:[%s2131_s15 + $0x50] sm:$0xff]  ;;  %v800_v31 = vld [vmem:[%s2131_s15 + $0x58] sm:$0xff] }
 0x192   : > { %v2377_v54 = vld [vmem:[%s2131_s15 + $0x40] sm:$0xff]  ;;  %v2381_v55 = vld [vmem:[%s2131_s15 + $0x48] sm:$0xff]  ;;  %v2386_v60 = vld [vmem:[%s2131_s15 + $0x30] sm:$0xff]  ;;  %v2418_v56 = vand.u32 127, %v805_v1 }
 0x193   : > { %v2389_v32 = vld [vmem:[%s2131_s15 + $0x38] sm:$0xff]  ;;  %v2394_v33 = vld [vmem:[%s2131_s15 + $0x20] sm:$0xff]  ;;  %v2397_v61 = vld [vmem:[%s2131_s15 + $0x28] sm:$0xff] }
 0x194   : > { %v2402_v62 = vld [vmem:[%s2131_s15 + $0x10] sm:$0xff]  ;;  %v2405_v63 = vld [vmem:[%s2131_s15 + $0x18] sm:$0xff]  ;;  %v2410_v13 = vld [vmem:[%s2131_s15] sm:$0xff]  ;;  %vm807_vm1 = vcmp.lt.s32.totalorder %v2418_v56, 32 }
 0x195   : > { %838 = vadd.xlane.f32.xlu0 %v804_v12  ;;  %834 = vadd.xlane.f32.xlu1 %v802_v30  ;;  %v2413_v0 = vld [vmem:[%s2131_s15 + $0x8] sm:$0xff] }
 0x199   : > { %828 = vadd.xlane.f32.xlu0 %v2373_v46  ;;  %830 = vadd.xlane.f32.xlu1 %v800_v31 }
 0x19d   : > { %824 = vadd.xlane.f32.xlu0 %v2377_v54  ;;  %826 = vadd.xlane.f32.xlu1 %v2381_v55 }
 0x1a1   : > { %820 = vadd.xlane.f32.xlu0 %v2386_v60  ;;  %822 = vadd.xlane.f32.xlu1 %v2389_v32 }
 0x1a5   : > { %816 = vadd.xlane.f32.xlu0 %v2394_v33  ;;  %818 = vadd.xlane.f32.xlu1 %v2397_v61 }
 0x1a9   : > { %812 = vadd.xlane.f32.xlu0 %v2402_v62  ;;  %814 = vadd.xlane.f32.xlu1 %v2405_v63 }
 0x1ad   : > { %808 = vadd.xlane.f32.xlu0 %v2410_v13  ;;  %810 = vadd.xlane.f32.xlu1 %v2413_v0 }
 0x21a   : > { %v837_v24 = vpop.xlane.xlu0 %836  ;;  %v833_v4 = vpop.xlane.xlu1 %832 }
 0x21b   : > { %v854_v35 = vmul.f32 0.03125, %v837_v24  ;;  %v852_v5 = vmul.f32 0.03125, %v833_v4 }
 0x21d   : > { %v870_v6 = vsub.f32 %v803_v36, %v854_v35  ;;  %v868_v47 = vsub.f32 %v801_v39, %v852_v5 }
 0x21e   : > { %v839_v7 = vpop.xlane.xlu0 %838  ;;  %v835_v8 = vpop.xlane.xlu1 %834 }
 0x21f   : > { %v855_v9 = vmul.f32 0.03125, %v839_v7  ;;  %v853_v25 = vmul.f32 0.03125, %v835_v8  ;;  %v2423_v10 = vsel %vm807_vm1, %v870_v6, 0.0  ;;  %v2427_v11 = vsel %vm807_vm1, %v868_v47, 0.0 }
 0x220   : > { %v902_v42 = vmul.f32 %v2423_v10, %v2423_v10  ;;  %v900_v20 = vmul.f32 %v2427_v11, %v2427_v11 }
 0x221   : > { %v871_v14 = vsub.f32 %v804_v12, %v855_v9  ;;  %v869_v15 = vsub.f32 %v802_v30, %v853_v25 }
 0x222   : > { %v829_v18 = vpop.xlane.xlu0 %828  ;;  %932 = vadd.xlane.f32.xlu0 %v902_v42  ;;  %v831_v19 = vpop.xlane.xlu1 %830 }
 0x223   : > { %v850_v21 = vmul.f32 0.03125, %v829_v18  ;;  %v851_v57 = vmul.f32 0.03125, %v831_v19  ;;  %v2435_v22 = vsel %vm807_vm1, %v871_v14, 0.0  ;;  %v2439_v43 = vsel %vm807_vm1, %v869_v15, 0.0 }
 0x224   : > { %v903_v23 = vmul.f32 %v2435_v22, %v2435_v22  ;;  %v901_v34 = vmul.f32 %v2439_v43, %v2439_v43 }
 0x225   : > { %v866_v2 = vsub.f32 %v2373_v46, %v850_v21  ;;  %v867_v52 = vsub.f32 %v800_v31, %v851_v57 }
 0x226   : > { %v825_v26 = vpop.xlane.xlu0 %824  ;;  %934 = vadd.xlane.f32.xlu1 %v903_v23  ;;  %928 = vadd.xlane.f32.xlu0 %v900_v20  ;;  %v827_v27 = vpop.xlane.xlu1 %826 }
 0x227   : > { %v848_v37 = vmul.f32 0.03125, %v825_v26  ;;  %v849_v38 = vmul.f32 0.03125, %v827_v27  ;;  %v2448_v40 = vsel %vm807_vm1, %v866_v2, 0.0  ;;  %v2452_v41 = vsel %vm807_vm1, %v867_v52, 0.0  ;;  %v1877_v26 = vld [vmem:[%s2133_s2 + $0x20] sm:$0xff]  }
 0x228   : > { %v898_v28 = vmul.f32 %v2448_v40, %v2448_v40  ;;  %v899_v45 = vmul.f32 %v2452_v41, %v2452_v41  ;;  %1716 = vmatprep.mubr.bf16.mxu1 %v1877_v26 }
 0x229   : > { %v864_v53 = vsub.f32 %v2377_v54, %v848_v37  ;;  %v865_v29 = vsub.f32 %v2381_v55, %v849_v38 }
 0x22a   : > { %v821_v44 = vpop.xlane.xlu0 %820  ;;  %930 = vadd.xlane.f32.xlu1 %v901_v34  ;;  %924 = vadd.xlane.f32.xlu0 %v898_v28  ;;  %v823_v58 = vpop.xlane.xlu1 %822 }
 0x22b   : > { %v846_v48 = vmul.f32 0.03125, %v821_v44  ;;  %v847_v3 = vmul.f32 0.03125, %v823_v58  ;;  %v2462_v49 = vsel %vm807_vm1, %v864_v53, 0.0  ;;  %v2466_v50 = vsel %vm807_vm1, %v865_v29, 0.0 }
 0x22c   : > { %v896_v51 = vmul.f32 %v2462_v49, %v2462_v49  ;;  %v897_v30 = vmul.f32 %v2466_v50, %v2466_v50 }
 0x22d   : > { %v862_v59 = vsub.f32 %v2386_v60, %v846_v48  ;;  %v863_v36 = vsub.f32 %v2389_v32, %v847_v3  ;;  %v1002_v48 = vshrl.u32 %v805_v1, 7 }
 0x22e   : > { %v817_v39 = vpop.xlane.xlu0 %816  ;;  %926 = vadd.xlane.f32.xlu1 %v899_v45  ;;  %920 = vadd.xlane.f32.xlu0 %v896_v51  ;;  %v819_v12 = vpop.xlane.xlu1 %818 }
 0x22f   : > { %v844_v46 = vmul.f32 0.03125, %v817_v39  ;;  %v845_v31 = vmul.f32 0.03125, %v819_v12  ;;  %v2476_v54 = vsel %vm807_vm1, %v862_v59, 0.0  ;;  %v2480_v55 = vsel %vm807_vm1, %v863_v36, 0.0 }
 0x230   : > { %v894_v60 = vmul.f32 %v2476_v54, %v2476_v54  ;;  %v895_v5 = vmul.f32 %v2480_v55, %v2480_v55 }
 0x231   : > { %v860_v32 = vsub.f32 %v2394_v33, %v844_v46  ;;  %v861_v24 = vsub.f32 %v2397_v61, %v845_v31 }
 0x232   : > { %v813_v4 = vpop.xlane.xlu0 %812  ;;  %922 = vadd.xlane.f32.xlu1 %v897_v30  ;;  %916 = vadd.xlane.f32.xlu0 %v894_v60  ;;  %v815_v35 = vpop.xlane.xlu1 %814  ;;  %v1003_v30 = vsub.s32 0, %v1002_v48 }
 0x233   : > { %v842_v6 = vmul.f32 0.03125, %v813_v4  ;;  %v843_v47 = vmul.f32 0.03125, %v815_v35  ;;  %v2490_v7 = vsel %vm807_vm1, %v860_v32, 0.0  ;;  %v2494_v8 = vsel %vm807_vm1, %v861_v24, 0.0 }
 0x234   : > { %v892_v33 = vmul.f32 %v2490_v7, %v2490_v7  ;;  %v893_v42 = vmul.f32 %v2494_v8, %v2494_v8  ;;  %v2532_v35 = vrot.slane %v2110_v16, %v1003_v30 }
 0x235   : > { %v858_v61 = vsub.f32 %v2402_v62, %v842_v6  ;;  %v859_v9 = vsub.f32 %v2405_v63, %v843_v47 }
 0x236   : > { %918 = vadd.xlane.f32.xlu1 %v895_v5  ;;  %912 = vadd.xlane.f32.xlu0 %v892_v33  ;;  %v809_v25 = vpop.xlane.xlu0 %808  ;;  %v811_v14 = vpop.xlane.xlu1 %810 }
 0x237   : > { %v840_v15 = vmul.f32 0.03125, %v809_v25  ;;  %v841_v18 = vmul.f32 0.03125, %v811_v14  ;;  %v2504_v19 = vsel %vm807_vm1, %v858_v61, 0.0  ;;  %v2508_v62 = vsel %vm807_vm1, %v859_v9, 0.0 }
 0x238   : > { %v890_v63 = vmul.f32 %v2504_v19, %v2504_v19  ;;  %v891_v57 = vmul.f32 %v2508_v62, %v2508_v62  ;;  %v2536_v9 = vrot.slane %v2115_v17, %v1003_v30 }
 0x239   : > { %v856_v20 = vsub.f32 %v2410_v13, %v840_v15  ;;  %v857_v21 = vsub.f32 %v2413_v0, %v841_v18  ;;  %v1876_v0 = vld [vmem:[%s2133_s2] sm:$0xff]  }
 0x23a   : > { %914 = vadd.xlane.f32.xlu1 %v893_v42  ;;  %908 = vadd.xlane.f32.xlu0 %v890_v63 }
 0x23b   : > { %v2518_v23 = vsel %vm807_vm1, %v856_v20, 0.0  ;;  %v2522_v2 = vsel %vm807_vm1, %v857_v21, 0.0  ;;  %1708 = vmatprep.mubr.bf16.mxu0 %v1876_v0 }
 0x23c   : > { %v888_v52 = vmul.f32 %v2518_v23, %v2518_v23  ;;  %v889_v13 = vmul.f32 %v2522_v2, %v2522_v2 }
 0x23e   : > { %910 = vadd.xlane.f32.xlu1 %v891_v57  ;;  %904 = vadd.xlane.f32.xlu0 %v888_v52 }
 0x242   : > { %906 = vadd.xlane.f32.xlu1 %v889_v13 }
 0x2ab   : > { %v933_v27 = vpop.xlane.xlu0 %932 }
 0x2ac   : > { %v950_v34 = vmul.f32 0.03125, %v933_v27 }
 0x2ae   : > { %v966_v37 = vadd.f32 1e-05, %v950_v34 }
 0x2af   : > { %v935_v38 = vpop.xlane.xlu1 %934  ;;  %v929_v56 = vpop.xlane.xlu0 %928 }
 0x2b0   : > { %1884 = vrsqrt.f32 %v966_v37  ;;  %v951_v28 = vmul.f32 0.03125, %v935_v38  ;;  %v948_v53 = vmul.f32 0.03125, %v929_v56 }
 0x2b2   : > { %v967_v29 = vadd.f32 1e-05, %v951_v28  ;;  %v964_v44 = vadd.f32 1e-05, %v948_v53 }
 0x2b3   : > { %v931_v58 = vpop.xlane.xlu1 %930  ;;  %v925_v45 = vpop.xlane.xlu0 %924 }
 0x2b4   : > { %1886 = vrsqrt.f32 %v967_v29  ;;  %v949_v3 = vmul.f32 0.03125, %v931_v58  ;;  %v946_v51 = vmul.f32 0.03125, %v925_v45 }
 0x2b5   : > { %1888 = vrsqrt.f32 %v964_v44 }
 0x2b6   : > { %v965_v59 = vadd.f32 1e-05, %v949_v3  ;;  %v962_v36 = vadd.f32 1e-05, %v946_v51 }
 0x2b7   : > { %v927_v39 = vpop.xlane.xlu1 %926  ;;  %v921_v12 = vpop.xlane.xlu0 %920 }
 0x2b8   : > { %1890 = vrsqrt.f32 %v965_v59  ;;  %v947_v46 = vmul.f32 0.03125, %v927_v39  ;;  %v944_v31 = vmul.f32 0.03125, %v921_v12 }
 0x2b9   : > { %1892 = vrsqrt.f32 %v962_v36 }
 0x2ba   : > { %v963_v60 = vadd.f32 1e-05, %v947_v46  ;;  %v960_v32 = vadd.f32 1e-05, %v944_v31 }
 0x2bb   : > { %v923_v24 = vpop.xlane.xlu1 %922  ;;  %v917_v4 = vpop.xlane.xlu0 %916 }
 0x2bc   : > { %1894 = vrsqrt.f32 %v963_v60  ;;  %v945_v1 = vmul.f32 0.03125, %v923_v24  ;;  %v942_v5 = vmul.f32 0.03125, %v917_v4 }
 0x2bd   : > { %v1885_v6 = vpop.eup %1884  ;;  %1896 = vrsqrt.f32 %v960_v32 }
 0x2be   : > { %v961_v47 = vadd.f32 1e-05, %v945_v1  ;;  %v958_v33 = vadd.f32 1e-05, %v942_v5  ;;  %v998_v61 = vmul.f32 %v1885_v6, %v2423_v10 }
 0x2bf   : > { %v919_v25 = vpop.xlane.xlu1 %918  ;;  %v913_v42 = vpop.xlane.xlu0 %912 }
 0x2c0   : > { %1898 = vrsqrt.f32 %v961_v47  ;;  %v943_v14 = vmul.f32 0.03125, %v919_v25  ;;  %v940_v15 = vmul.f32 0.03125, %v913_v42  ;;  %v1020_v16 = vmul.f32 %v2532_v35, %v998_v61 }
 0x2c1   : > { %v1887_v18 = vpop.eup %1886  ;;  %1900 = vrsqrt.f32 %v958_v33 }
 0x2c2   : > { %v1889_v63 = vpop.eup %1888  ;;  %v959_v20 = vadd.f32 1e-05, %v943_v14  ;;  %v956_v21 = vadd.f32 1e-05, %v940_v15  ;;  %v999_v57 = vmul.f32 %v1887_v18, %v2435_v22  ;;  %v1042_v10 = vadd.f32 %v2536_v9, %v1020_v16 }
 0x2c3   : > { %v915_v52 = vpop.xlane.xlu1 %914  ;;  %v909_v13 = vpop.xlane.xlu0 %908  ;;  %v996_v17 = vmul.f32 %v1889_v63, %v2427_v11 }
 0x2c4   : > { %1902 = vrsqrt.f32 %v959_v20  ;;  %v941_v0 = vmul.f32 0.03125, %v915_v52  ;;  %v938_v26 = vmul.f32 0.03125, %v909_v13  ;;  %v1021_v27 = vmul.f32 %v2532_v35, %v999_v57 }
 0x2c5   : > { %v1891_v34 = vpop.eup %1890  ;;  %1904 = vrsqrt.f32 %v956_v21  ;;  %v1018_v37 = vmul.f32 %v2532_v35, %v996_v17  ;;  %v1058_v58 = vmax.f32 %v1042_v10, 0.0 }
 0x2c6   : > { %v1893_v38 = vpop.eup %1892  ;;  %v957_v56 = vadd.f32 1e-05, %v941_v0  ;;  %v954_v28 = vadd.f32 1e-05, %v938_v26  ;;  %v1043_v22 = vadd.f32 %v2536_v9, %v1021_v27  ;;  %v997_v53 = vmul.f32 %v1891_v34, %v2439_v43 }
 0x2c7   : > { %v911_v29 = vpop.xlane.xlu1 %910  ;;  %v905_v44 = vpop.xlane.xlu0 %904  ;;  %v994_v11 = vmul.f32 %v1893_v38, %v2448_v40  ;;  %v1040_v36 = vadd.f32 %v2536_v9, %v1018_v37 }
 0x2c8   : > { %1906 = vrsqrt.f32 %v957_v56  ;;  %v939_v45 = vmul.f32 0.03125, %v911_v29  ;;  %v936_v48 = vmul.f32 0.03125, %v905_v44  ;;  %v1059_v3 = vmax.f32 %v1043_v22, 0.0 }
 0x2c9   : > { %v1895_v51 = vpop.eup %1894  ;;  %1908 = vrsqrt.f32 %v954_v28  ;;  %v1019_v59 = vmul.f32 %v2532_v35, %v997_v53  ;;  %v1016_v39 = vmul.f32 %v2532_v35, %v994_v11  ;;  %v1056_v6 = vmax.f32 %v1040_v36, 0.0 }
 0x2ca   : > { %v1897_v12 = vpop.eup %1896  ;;  %v955_v30 = vadd.f32 1e-05, %v939_v45  ;;  %v952_v43 = vadd.f32 1e-05, %v936_v48  ;;  %v1067_v46 = vpack.c.bf16 %v1059_v3, %v1058_v58  ;;  %v995_v31 = vmul.f32 %v1895_v51, %v2452_v41 }
 0x2cb   : > { %v907_v60 = vpop.xlane.xlu1 %906  ;;  %v1041_v40 = vadd.f32 %v2536_v9, %v1019_v59  ;;  %v1038_v32 = vadd.f32 %v2536_v9, %v1016_v39  ;;  %v992_v24 = vmul.f32 %v1897_v12, %v2462_v49 }
 0x2cc   : > { %1910 = vrsqrt.f32 %v955_v30  ;;  %v937_v4 = vmul.f32 0.03125, %v907_v60  ;;  %1692 = vmatprep.subr.bf16.mxu0 %v1067_v46  ;;  %1756 = vmatprep.subr.bf16.mxu1 %v1067_v46  ;;  %v1017_v1 = vmul.f32 %v2532_v35, %v995_v31 }
 0x2cd   : > { %v1899_v5 = vpop.eup %1898  ;;  %1912 = vrsqrt.f32 %v952_v43  ;;  %1693 = vmatpush3.bf16.msra.mxu0 %v1067_v46  ;;  %1764 = vmatpush3.bf16.msra.mxu1 %v1067_v46  ;;  %v1057_v47 = vmax.f32 %v1041_v40, 0.0  ;;  %v1014_v41 = vmul.f32 %v2532_v35, %v992_v24  ;;  %v1054_v14 = vmax.f32 %v1038_v32, 0.0 }
 0x2ce   : > { %v1901_v33 = vpop.eup %1900  ;;  %v953_v61 = vadd.f32 1e-05, %v937_v4  ;;  %v1039_v25 = vadd.f32 %v2536_v9, %v1017_v1  ;;  %v993_v49 = vmul.f32 %v1899_v5, %v2466_v50  ;;  %v1879_v1 = vld [vmem:[%s2133_s2 + $0x28] sm:$0xff]   ;;  %v1880_v5 = vld [vmem:[%s2133_s2 + $0x10] sm:$0xff]  }
 0x2cf   : > { %v1066_v42 = vpack.c.bf16 %v1057_v47, %v1056_v6  ;;  %v990_v15 = vmul.f32 %v1901_v33, %v2476_v54  ;;  %v1036_v63 = vadd.f32 %v2536_v9, %v1014_v41  ;;  %v1881_v6 = vld [vmem:[%s2133_s2 + $0x30] sm:$0xff]   ;;  %v1883_v47 = vld [vmem:[%s2133_s2 + $0x38] sm:$0xff]  }
 0x2d0   : > { %1914 = vrsqrt.f32 %v953_v61  ;;  %v1055_v16 = vmax.f32 %v1039_v25, 0.0  ;;  %v1015_v18 = vmul.f32 %v2532_v35, %v993_v49  ;;  %v1070_v41 = vld [vmem:[#allocation2 + $0x58] sm:$0xff]  ;;  %v1078_v33 = vld [vmem:[#allocation2 + $0x10] sm:$0xff] }
 0x2d1   : > { %v1903_v20 = vpop.eup %1902  ;;  %1694 = vmatprep.subr.bf16.mxu0 %v1066_v42  ;;  %1757 = vmatprep.subr.bf16.mxu1 %v1066_v42  ;;  %v1012_v21 = vmul.f32 %v2532_v35, %v990_v15  ;;  %v1052_v10 = vmax.f32 %v1036_v63, 0.0  ;;  %v1068_v49 = vld [vmem:[#allocation2 + $0x30] sm:$0xff]  ;;  %v1071_v63 = vld [vmem:[#allocation2 + $0x18] sm:$0xff] }
 0x2d2   : > { %v1905_v57 = vpop.eup %1904  ;;  %1695 = vmatpush3.bf16.msra.mxu0 %v1066_v42  ;;  %1765 = vmatpush3.bf16.msra.mxu1 %v1066_v42  ;;  %v1065_v52 = vpack.c.bf16 %v1055_v16, %v1054_v14  ;;  %v1037_v50 = vadd.f32 %v2536_v9, %v1015_v18  ;;  %v991_v13 = vmul.f32 %v1903_v20, %v2480_v55  ;;  %v1076_v42 = vld [vmem:[#allocation2 + $0x40] sm:$0xff]  ;;  %v1079_v20 = vld [vmem:[#allocation2 + $0x38] sm:$0xff] }
 0x2d3   : > { %v988_v54 = vmul.f32 %v1905_v57, %v2490_v7  ;;  %v1034_v26 = vadd.f32 %v2536_v9, %v1012_v21 }
 0x2d4   : > { %1696 = vmatprep.subr.bf16.mxu0 %v1065_v52  ;;  %1758 = vmatprep.subr.bf16.mxu1 %v1065_v52  ;;  %v1053_v17 = vmax.f32 %v1037_v50, 0.0  ;;  %v1013_v0 = vmul.f32 %v2532_v35, %v991_v13  ;;  %v1069_v13 = vld [vmem:[#allocation2] sm:$0xff] }
 0x2d5   : > { %v1907_v27 = vpop.eup %1906  ;;  %v1010_v34 = vmul.f32 %v2532_v35, %v988_v54  ;;  %v1050_v28 = vmax.f32 %v1034_v26, 0.0  ;;  %v1077_v54 = vld [vmem:[#allocation2 + $0x20] sm:$0xff] }
 0x2d6   : > { %v1909_v37 = vpop.eup %1908  ;;  %1697 = vmatpush3.bf16.msra.mxu0 %v1065_v52  ;;  %1766 = vmatpush3.bf16.msra.mxu1 %v1065_v52  ;;  %v1064_v38 = vpack.c.bf16 %v1053_v17, %v1052_v10  ;;  %v1035_v56 = vadd.f32 %v2536_v9, %v1013_v0  ;;  %v989_v55 = vmul.f32 %v1907_v27, %v2494_v8  ;;  %v1074_v27 = vld [vmem:[#allocation2 + $0x8] sm:$0xff] }
 0x2d7   : > { %v986_v7 = vmul.f32 %v1909_v37, %v2504_v19  ;;  %v1032_v29 = vadd.f32 %v2536_v9, %v1010_v34  ;;  %v1082_v34 = vld [vmem:[#allocation2 + $0x78] sm:$0xff] }
 0x2d8   : > { %1698 = vmatprep.subr.bf16.mxu0 %v1064_v38  ;;  %1759 = vmatprep.subr.bf16.mxu1 %v1064_v38  ;;  %v1051_v22 = vmax.f32 %v1035_v56, 0.0  ;;  %v1011_v53 = vmul.f32 %v2532_v35, %v989_v55 }
 0x2d9   : > { %v1911_v44 = vpop.eup %1910  ;;  %v1008_v58 = vmul.f32 %v2532_v35, %v986_v7  ;;  %v1048_v3 = vmax.f32 %v1032_v29, 0.0  ;;  %v1072_v7 = vld [vmem:[#allocation2 + $0x50] sm:$0xff] }
 0x2da   : > { %v1913_v11 = vpop.eup %1912  ;;  %1699 = vmatpush3.bf16.msra.mxu0 %v1064_v38  ;;  %1767 = vmatpush3.bf16.msra.mxu1 %v1064_v38  ;;  %v1063_v45 = vpack.c.bf16 %v1051_v22, %v1050_v28  ;;  %v1033_v48 = vadd.f32 %v2536_v9, %v1011_v53  ;;  %v987_v8 = vmul.f32 %v1911_v44, %v2508_v62  ;;  %v1080_v28 = vld [vmem:[#allocation2 + $0x60] sm:$0xff] }
 0x2db   : > { %v984_v19 = vmul.f32 %v1913_v11, %v2518_v23  ;;  %v1030_v36 = vadd.f32 %v2536_v9, %v1008_v58  ;;  %v1075_v58 = vld [vmem:[#allocation2 + $0x48] sm:$0xff] }
 0x2dc   : > { %1700 = vmatprep.subr.bf16.mxu0 %v1063_v45  ;;  %1760 = vmatprep.subr.bf16.mxu1 %v1063_v45  ;;  %v1049_v51 = vmax.f32 %v1033_v48, 0.0  ;;  %v1009_v59 = vmul.f32 %v2532_v35, %v987_v8  ;;  %v1083_v11 = vld [vmem:[#allocation2 + $0x28] sm:$0xff] }
 0x2dd   : > { %v1915_v39 = vpop.eup %1914  ;;  %v1006_v12 = vmul.f32 %v2532_v35, %v984_v19  ;;  %v1046_v23 = vmax.f32 %v1030_v36, 0.0 }
 0x2de   : > { %1701 = vmatpush3.bf16.msra.mxu0 %v1063_v45  ;;  %1768 = vmatpush3.bf16.msra.mxu1 %v1063_v45  ;;  %v1062_v30 = vpack.c.bf16 %v1049_v51, %v1048_v3  ;;  %v1031_v43 = vadd.f32 %v2536_v9, %v1009_v59  ;;  %v985_v62 = vmul.f32 %v1915_v39, %v2522_v2  ;;  %v1073_v3 = vld [vmem:[#allocation2 + $0x68] sm:$0xff]  ;;  %v1081_v51 = vld [vmem:[#allocation2 + $0x70] sm:$0xff] }
 0x2df   : > { %v1028_v60 = vadd.f32 %v2536_v9, %v1006_v12 }
 0x2e0   : > { %1702 = vmatprep.subr.bf16.mxu0 %v1062_v30  ;;  %1761 = vmatprep.subr.bf16.mxu1 %v1062_v30  ;;  %v1047_v46 = vmax.f32 %v1031_v43, 0.0  ;;  %v1007_v31 = vmul.f32 %v2532_v35, %v985_v62  ;;  %v1878_v35 = vld [vmem:[%s2133_s2 + $0x8] sm:$0xff]  }
 0x2e1   : > { %v1044_v2 = vmax.f32 %v1028_v60, 0.0 }
 0x2e2   : > { %1703 = vmatpush3.bf16.msra.mxu0 %v1062_v30  ;;  %1769 = vmatpush3.bf16.msra.mxu1 %v1062_v30  ;;  %v1061_v40 = vpack.c.bf16 %v1047_v46, %v1046_v23  ;;  %v1029_v32 = vadd.f32 %v2536_v9, %v1007_v31  ;;  %v1882_v9 = vld [vmem:[%s2133_s2 + $0x18] sm:$0xff]  }
 0x2e4   : > { %1704 = vmatprep.subr.bf16.mxu0 %v1061_v40  ;;  %1762 = vmatprep.subr.bf16.mxu1 %v1061_v40  ;;  %v1045_v24 = vmax.f32 %v1029_v32, 0.0 }
 0x2e6   : > { %1705 = vmatpush3.bf16.msra.mxu0 %v1061_v40  ;;  %1770 = vmatpush3.bf16.msra.mxu1 %v1061_v40  ;;  %v1060_v4 = vpack.c.bf16 %v1045_v24, %v1044_v2 }
 0x2e8   : > { %1706 = vmatprep.subr.bf16.mxu0 %v1060_v4  ;;  %1763 = vmatprep.subr.bf16.mxu1 %v1060_v4 }
 0x2ea   : > { %1707 = vmatpush3.bf16.msra.mxu0 %v1060_v4  ;;  %1771 = vmatpush3.bf16.msra.mxu1 %v1060_v4 }
 0x2ed   : > { %1709 = vmatmul.mubr.bf16.vlgmr.msra.gmra.mxu0 %v1878_v35  ;;  %1717 = vmatmul.mubr.bf16.vlgmr.msra.gmra.mxu1 %v1879_v1 }
 0x2ee   : > { %1712 = vmatprep.mubr.bf16.mxu0 %v1880_v5  ;;  %1720 = vmatprep.mubr.bf16.mxu1 %v1881_v6 }
 0x2f5   : > { %1713 = vmatmul.mubr.bf16.gmra.mxu0 %v1882_v9  ;;  %1721 = vmatmul.mubr.bf16.gmra.mxu1 %v1883_v47 }
 0x3ad   : > { %v1710_v61 = vpop.f32.mrf.mxu0  ;;  %v1718_v25 = vpop.f32.mrf.mxu1 }
 0x3ae   : > { %v1247_v14 = vadd.f32 %v1710_v61, %v1070_v41  ;;  %v1255_v15 = vadd.f32 %v1718_v25, %v1078_v33 }
 0x3af   : > { %v1182_v16 = vpop.f32.mrf.mxu0  ;;  %v1214_v18 = vpop.f32.mrf.mxu1 }
 0x3b0   : > { %1263 = vst [vmem:[#allocation2 + $0x58] sm:$0xff] %v1247_v14  ;;  %1271 = vst [vmem:[#allocation2 + $0x10] sm:$0xff] %v1255_v15  ;;  %v1245_v21 = vadd.f32 %v1182_v16, %v1068_v49  ;;  %v1253_v57 = vadd.f32 %v1214_v18, %v1076_v42 }
 0x3b1   : > { %v1711_v52 = vpop.f32.mrf.mxu0  ;;  %v1719_v50 = vpop.f32.mrf.mxu1 }
 0x3b2   : > { %1261 = vst [vmem:[#allocation2 + $0x30] sm:$0xff] %v1245_v21  ;;  %1269 = vst [vmem:[#allocation2 + $0x40] sm:$0xff] %v1253_v57  ;;  %v1248_v10 = vadd.f32 %v1711_v52, %v1071_v63  ;;  %v1256_v17 = vadd.f32 %v1719_v50, %v1079_v20 }
 0x3b3   : > { %v1185_v0 = vpop.f32.mrf.mxu0  ;;  %v1217_v26 = vpop.f32.mrf.mxu1 }
 0x3b4   : > { %1264 = vst [vmem:[#allocation2 + $0x18] sm:$0xff] %v1248_v10  ;;  %1272 = vst [vmem:[#allocation2 + $0x38] sm:$0xff] %v1256_v17  ;;  %v1246_v37 = vadd.f32 %v1185_v0, %v1069_v13  ;;  %v1254_v38 = vadd.f32 %v1217_v26, %v1077_v54 }
 0x3b5   : > { %v1714_v56 = vpop.f32.mrf.mxu0  ;;  %v1722_v55 = vpop.f32.mrf.mxu1 }
 0x3b6   : > { %1262 = vst [vmem:[#allocation2] sm:$0xff] %v1246_v37  ;;  %1270 = vst [vmem:[#allocation2 + $0x20] sm:$0xff] %v1254_v38  ;;  %v1251_v22 = vadd.f32 %v1714_v56, %v1074_v27  ;;  %v1259_v53 = vadd.f32 %v1722_v55, %v1082_v34 }
 0x3b7   : > { %v1198_v29 = vpop.f32.mrf.mxu0  ;;  %v1230_v44 = vpop.f32.mrf.mxu1 }
 0x3b8   : > { %1267 = vst [vmem:[#allocation2 + $0x8] sm:$0xff] %v1251_v22  ;;  %1275 = vst [vmem:[#allocation2 + $0x78] sm:$0xff] %v1259_v53  ;;  %v1249_v45 = vadd.f32 %v1198_v29, %v1072_v7  ;;  %v1257_v48 = vadd.f32 %v1230_v44, %v1080_v28 }
 0x3b9   : > { %v1715_v8 = vpop.f32.mrf.mxu0  ;;  %v1723_v19 = vpop.f32.mrf.mxu1 }
 0x3ba   : > { %1265 = vst [vmem:[#allocation2 + $0x50] sm:$0xff] %v1249_v45  ;;  %1273 = vst [vmem:[#allocation2 + $0x60] sm:$0xff] %v1257_v48  ;;  %v1252_v59 = vadd.f32 %v1715_v8, %v1075_v58  ;;  %v1260_v36 = vadd.f32 %v1723_v19, %v1083_v11  ;;  %1280 = sbr.rel (%p1647_p13) target bundleno = 1204 (0x4b4), region = 101 }
 0x3bb   : > { %v1201_v39 = vpop.f32.mrf.mxu0  ;;  %v1233_v12 = vpop.f32.mrf.mxu1 }
 0x3bc   : > { %1268 = vst [vmem:[#allocation2 + $0x48] sm:$0xff] %v1252_v59  ;;  %1276 = vst [vmem:[#allocation2 + $0x28] sm:$0xff] %v1260_v36  ;;  %v1250_v30 = vadd.f32 %v1201_v39, %v1073_v3  ;;  %v1258_v43 = vadd.f32 %v1233_v12, %v1081_v51 }
 0x3be   : > { %1266 = vst [vmem:[#allocation2 + $0x68] sm:$0xff] %v1250_v30  ;;  %1274 = vst [vmem:[#allocation2 + $0x70] sm:$0xff] %v1258_v43 }
 0x3bf   : > { %v1916_v62 = vld [vmem:[%s2695_s5 + $0x38] sm:$0xff]   ;;  %v1917_v23 = vld [vmem:[%s2695_s5 + $0x30] sm:$0xff]   ;;  %v1918_v46 = vld [vmem:[%s2695_s5 + $0x28] sm:$0xff]  }
 0x3c0   : > { %1724 = vmatprep.subr.bf16.mxu0 %v1916_v62  ;;  %1772 = vmatprep.subr.bf16.mxu1 %v1916_v62  ;;  %v1919_v31 = vld [vmem:[%s2695_s5 + $0x20] sm:$0xff]   ;;  %v1281_v60 = vld [vmem:[#allocation2 + $0x30] sm:$0xff]  ;;  %v1920_v35 = vld [vmem:[%s2695_s5 + $0x18] sm:$0xff]  }
 0x3c1   : > { %1725 = vmatpush3.bf16.msra.mxu0 %v1916_v62  ;;  %1780 = vmatpush3.bf16.msra.mxu1 %v1916_v62  ;;  %v1282_v40 = vld [vmem:[#allocation2] sm:$0xff]  ;;  %v1921_v1 = vld [vmem:[%s2695_s5 + $0x10] sm:$0xff]   ;;  %v1922_v5 = vld [vmem:[%s2695_s5 + $0x8] sm:$0xff]  }
 0x3c2   : > { %1726 = vmatprep.subr.bf16.mxu0 %v1917_v23  ;;  %1773 = vmatprep.subr.bf16.mxu1 %v1917_v23  ;;  %v1289_v32 = vld [vmem:[#allocation2 + $0x40] sm:$0xff]  ;;  %v1297_v2 = vpack.c.bf16 %v1282_v40, %v1281_v60  ;;  %v1283_v9 = vld [vmem:[#allocation2 + $0x58] sm:$0xff]  ;;  %v1291_v41 = vld [vmem:[#allocation2 + $0x10] sm:$0xff] }
 0x3c3   : > { %v1290_v24 = vld [vmem:[#allocation2 + $0x20] sm:$0xff]  ;;  %v1284_v47 = vld [vmem:[#allocation2 + $0x18] sm:$0xff]  ;;  %v1285_v61 = vld [vmem:[#allocation2 + $0x50] sm:$0xff] }
 0x3c4   : > { %v1301_v4 = vpack.c.bf16 %v1290_v24, %v1289_v32  ;;  %1740 = vmatprep.mubr.bf16.mxu0 %v1297_v2  ;;  %v1923_v6 = vld [vmem:[%s2695_s5] sm:$0xff]   ;;  %v1292_v33 = vld [vmem:[#allocation2 + $0x38] sm:$0xff]  ;;  %v1298_v14 = vpack.c.bf16 %v1284_v47, %v1283_v9  ;;  %v1287_v63 = vld [vmem:[#allocation2 + $0x8] sm:$0xff] }
 0x3c5   : > { %1727 = vmatpush3.bf16.msra.mxu0 %v1917_v23  ;;  %1781 = vmatpush3.bf16.msra.mxu1 %v1917_v23  ;;  %v1286_v25 = vld [vmem:[#allocation2 + $0x68] sm:$0xff]  ;;  %v1293_v49 = vld [vmem:[#allocation2 + $0x60] sm:$0xff]  ;;  %v1294_v42 = vld [vmem:[#allocation2 + $0x70] sm:$0xff]  ;;  %v1302_v15 = vpack.c.bf16 %v1292_v33, %v1291_v41 }
 0x3c6   : > { %1728 = vmatprep.subr.bf16.mxu0 %v1918_v46  ;;  %1774 = vmatprep.subr.bf16.mxu1 %v1918_v46  ;;  %v1299_v16 = vpack.c.bf16 %v1286_v25, %v1285_v61  ;;  %v1303_v18 = vpack.c.bf16 %v1294_v42, %v1293_v49  ;;  %v1288_v20 = vld [vmem:[#allocation2 + $0x48] sm:$0xff]  ;;  %v1295_v21 = vld [vmem:[#allocation2 + $0x78] sm:$0xff]  ;;  %v2619_v13 = vld [vmem:[%s2696_s6] ss:$0 sm:$0xff] }
 0x3c7   : > { %1748 = vmatprep.mubr.bf16.mxu1 %v1301_v4  ;;  %v1296_v57 = vld [vmem:[#allocation2 + $0x28] sm:$0xff]  ;;  %v1300_v52 = vpack.c.bf16 %v1288_v20, %v1287_v63  ;;  %v1475_v10 = vld [vmem:[%s2121_s27 + $0x10] sm:$0xff]  ;;  %v1473_v37 = vld [vmem:[%s2121_s27] sm:$0xff] }
 0x3c8   : > { %v1304_v50 = vpack.c.bf16 %v1296_v57, %v1295_v21  ;;  %v1483_v0 = vld [vmem:[%s2121_s27 + $0x50] sm:$0xff]  ;;  %v1481_v56 = vld [vmem:[%s2121_s27 + $0x40] sm:$0xff]  ;;  %v1476_v29 = vld [vmem:[%s2121_s27 + $0x18] sm:$0xff] }
 0x3c9   : > { %1729 = vmatpush3.bf16.msra.mxu0 %v1918_v46  ;;  %1782 = vmatpush3.bf16.msra.mxu1 %v1918_v46  ;;  %v1484_v58 = vld [vmem:[%s2121_s27 + $0x58] sm:$0xff]  ;;  %v1474_v3 = vld [vmem:[%s2121_s27 + $0x8] sm:$0xff]  ;;  %v1479_v62 = vld [vmem:[%s2121_s27 + $0x30] sm:$0xff] }
 0x3ca   : > { %1730 = vmatprep.subr.bf16.mxu0 %v1919_v31  ;;  %1775 = vmatprep.subr.bf16.mxu1 %v1919_v31  ;;  %v1482_v59 = vld [vmem:[%s2121_s27 + $0x48] sm:$0xff]  ;;  %v1487_v46 = vld [vmem:[%s2121_s27 + $0x70] sm:$0xff]  ;;  %v1477_v24 = vld [vmem:[%s2121_s27 + $0x20] sm:$0xff] }
 0x3cb   : > { %v1480_v41 = vld [vmem:[%s2121_s27 + $0x38] sm:$0xff]  ;;  %v1486_v63 = vld [vmem:[%s2121_s27 + $0x68] sm:$0xff] }
 0x3cc   : > { %v1488_v61 = vld [vmem:[%s2121_s27 + $0x78] sm:$0xff] }
 0x3cd   : > { %1731 = vmatpush3.bf16.msra.mxu0 %v1919_v31  ;;  %1783 = vmatpush3.bf16.msra.mxu1 %v1919_v31 }
 0x3ce   : > { %1732 = vmatprep.subr.bf16.mxu0 %v1920_v35  ;;  %1776 = vmatprep.subr.bf16.mxu1 %v1920_v35 }
 0x3d1   : > { %1733 = vmatpush3.bf16.msra.mxu0 %v1920_v35  ;;  %1784 = vmatpush3.bf16.msra.mxu1 %v1920_v35  ;;  %v1485_v35 = vld [vmem:[%s2121_s27 + $0x60] sm:$0xff] }
 0x3d2   : > { %1734 = vmatprep.subr.bf16.mxu0 %v1921_v1  ;;  %1777 = vmatprep.subr.bf16.mxu1 %v1921_v1 }
 0x3d5   : > { %1735 = vmatpush3.bf16.msra.mxu0 %v1921_v1  ;;  %1785 = vmatpush3.bf16.msra.mxu1 %v1921_v1 }
 0x3d6   : > { %1736 = vmatprep.subr.bf16.mxu0 %v1922_v5  ;;  %1778 = vmatprep.subr.bf16.mxu1 %v1922_v5 }
 0x3d9   : > { %1737 = vmatpush3.bf16.msra.mxu0 %v1922_v5  ;;  %1786 = vmatpush3.bf16.msra.mxu1 %v1922_v5 }
 0x3da   : > { %1738 = vmatprep.subr.bf16.mxu0 %v1923_v6  ;;  %1779 = vmatprep.subr.bf16.mxu1 %v1923_v6 }
 0x3dd   : > { %1739 = vmatpush3.bf16.msra.mxu0 %v1923_v6  ;;  %1787 = vmatpush3.bf16.msra.mxu1 %v1923_v6 }
 0x3e0   : > { %1741 = vmatmul.mubr.bf16.vlgmr.msra.gmra.mxu0 %v1298_v14  ;;  %1749 = vmatmul.mubr.bf16.vlgmr.msra.gmra.mxu1 %v1302_v15 }
 0x3e1   : > { %1744 = vmatprep.mubr.bf16.mxu0 %v1299_v16  ;;  %1752 = vmatprep.mubr.bf16.mxu1 %v1303_v18  ;;  %v1478_v16 = vld [vmem:[%s2121_s27 + $0x28] sm:$0xff] }
 0x3e8   : > { %1745 = vmatmul.mubr.bf16.gmra.mxu0 %v1300_v52  ;;  %1753 = vmatmul.mubr.bf16.gmra.mxu1 %v1304_v50 }
 0x4a0   : > { %v1742_v54 = vpop.f32.mrf.mxu0  ;;  %v1750_v17 = vpop.f32.mrf.mxu1 }
 0x4a1   : > { %v1419_v26 = vadd.f32 %v1742_v54, %v2619_v13  ;;  %v1451_v27 = vadd.f32 %v1750_v17, %v2619_v13 }
 0x4a2   : > { %v1410_v34 = vpop.f32.mrf.mxu0  ;;  %v1442_v38 = vpop.f32.mrf.mxu1 }
 0x4a3   : > { %v1491_v55 = vadd.f32 %v1475_v10, %v1419_v26  ;;  %v1499_v7 = vadd.f32 %v1483_v0, %v1451_v27  ;;  %v1411_v28 = vadd.f32 %v2619_v13, %v1410_v34  ;;  %v1443_v22 = vadd.f32 %v2619_v13, %v1442_v38 }
 0x4a4   : > { %v1743_v53 = vpop.f32.mrf.mxu0  ;;  %v1751_v44 = vpop.f32.mrf.mxu1 }
 0x4a5   : > { %1507 = vst [vmem:[%s2126_s17 + $0x10] sm:$0xff] %v1491_v55  ;;  %1515 = vst [vmem:[%s2126_s17 + $0x50] sm:$0xff] %v1499_v7  ;;  %v1489_v11 = vadd.f32 %v1473_v37, %v1411_v28  ;;  %v1497_v45 = vadd.f32 %v1481_v56, %v1443_v22  ;;  %v1422_v48 = vadd.f32 %v1743_v53, %v2619_v13 }
 0x4a6   : > { %v1454_v8 = vadd.f32 %v1751_v44, %v2619_v13  ;;  %v1413_v19 = vpop.f32.mrf.mxu0  ;;  %v1445_v51 = vpop.f32.mrf.mxu1 }
 0x4a7   : > { %1505 = vst [vmem:[%s2126_s17] sm:$0xff] %v1489_v11  ;;  %1513 = vst [vmem:[%s2126_s17 + $0x40] sm:$0xff] %v1497_v45  ;;  %v1492_v36 = vadd.f32 %v1476_v29, %v1422_v48  ;;  %v1414_v12 = vadd.f32 %v2619_v13, %v1413_v19  ;;  %v1446_v30 = vadd.f32 %v2619_v13, %v1445_v51 }
 0x4a8   : > { %v1500_v39 = vadd.f32 %v1484_v58, %v1454_v8  ;;  %v1746_v43 = vpop.f32.mrf.mxu0  ;;  %v1754_v23 = vpop.f32.mrf.mxu1 }
 0x4a9   : > { %1508 = vst [vmem:[%s2126_s17 + $0x18] sm:$0xff] %v1492_v36  ;;  %v1490_v31 = vadd.f32 %v1474_v3, %v1414_v12  ;;  %v1498_v60 = vadd.f32 %v1482_v59, %v1446_v30  ;;  %v1435_v40 = vadd.f32 %v1746_v43, %v2619_v13  ;;  %v1467_v32 = vadd.f32 %v1754_v23, %v2619_v13 }
 0x4aa   : > { %1516 = vst [vmem:[%s2126_s17 + $0x58] sm:$0xff] %v1500_v39  ;;  %v1426_v2 = vpop.f32.mrf.mxu0  ;;  %v1458_v4 = vpop.f32.mrf.mxu1 }
 0x4ab   : > { %1506 = vst [vmem:[%s2126_s17 + $0x8] sm:$0xff] %v1490_v31  ;;  %1514 = vst [vmem:[%s2126_s17 + $0x48] sm:$0xff] %v1498_v60  ;;  %v1495_v1 = vadd.f32 %v1479_v62, %v1435_v40  ;;  %v1503_v5 = vadd.f32 %v1487_v46, %v1467_v32  ;;  %v1427_v6 = vadd.f32 %v2619_v13, %v1426_v2 }
 0x4ac   : > { %v1459_v9 = vadd.f32 %v2619_v13, %v1458_v4  ;;  %v1747_v47 = vpop.f32.mrf.mxu0  ;;  %v1755_v33 = vpop.f32.mrf.mxu1 }
 0x4ad   : > { %1511 = vst [vmem:[%s2126_s17 + $0x30] sm:$0xff] %v1495_v1  ;;  %1519 = vst [vmem:[%s2126_s17 + $0x70] sm:$0xff] %v1503_v5  ;;  %v1493_v25 = vadd.f32 %v1477_v24, %v1427_v6  ;;  %v1438_v42 = vadd.f32 %v1747_v47, %v2619_v13  ;;  %v1470_v14 = vadd.f32 %v1755_v33, %v2619_v13 }
 0x4ae   : > { %v1501_v49 = vadd.f32 %v1485_v35, %v1459_v9  ;;  %v1429_v15 = vpop.f32.mrf.mxu0  ;;  %v1461_v18 = vpop.f32.mrf.mxu1 }
 0x4af   : > { %1509 = vst [vmem:[%s2126_s17 + $0x20] sm:$0xff] %v1493_v25  ;;  %v1496_v20 = vadd.f32 %v1480_v41, %v1438_v42  ;;  %v1504_v21 = vadd.f32 %v1488_v61, %v1470_v14  ;;  %v1430_v57 = vadd.f32 %v2619_v13, %v1429_v15  ;;  %v1462_v52 = vadd.f32 %v2619_v13, %v1461_v18 }
 0x4b0   : > { %1517 = vst [vmem:[%s2126_s17 + $0x60] sm:$0xff] %v1501_v49 }
 0x4b1   : > { %1512 = vst [vmem:[%s2126_s17 + $0x38] sm:$0xff] %v1496_v20  ;;  %1520 = vst [vmem:[%s2126_s17 + $0x78] sm:$0xff] %v1504_v21  ;;  %v1494_v50 = vadd.f32 %v1478_v16, %v1430_v57  ;;  %v1502_v54 = vadd.f32 %v1486_v63, %v1462_v52 }
 0x4b3   : > { %1510 = vst [vmem:[%s2126_s17 + $0x28] sm:$0xff] %v1494_v50  ;;  %1518 = vst [vmem:[%s2126_s17 + $0x68] sm:$0xff] %v1502_v54 }
 0x4b4 PF: > { %s18_s11 = sadd.s32 1, %s1978_s11   ;;  %s2701_s27 = smov %s1958_s28 }
 0x4b5   : > { %p15_p0 = scmp.ge.s32.totalorder %s18_s11, 6   ;;  %s2702_s28 = smov %s2076_s18 }
 0x4b6   : > { %s2703_s29 = smov %s1970_s9  ;;  %s2704_s30 = smov %s1974_s10 }
 0x4b7   : > { %s2705_s9 = smov %s2708_s12  ;;  %s2706_s10 = smov %s2712_s13 }
 0x4b8   :  { %17 = sbr.rel (!%p15_p0) target bundleno = 6 (0x6), region = 142 }

</bundles_post_ra>
